<compile_context>
chip_gen: v7x
topology: tpu7x:2x2x1
jax: 0.10.0
libtpu: 0.0.40
codegen_flags: <defaults>
</compile_context>

<pallas_src>
import math

import jax
import jax.numpy as jnp
from jax import lax
from jax.experimental import pallas as pl
from jax.experimental.pallas import tpu as pltpu

_MH_COEF = 2.0 / (math.sqrt(3.0) * math.pi ** 0.25)  # mexican-hat normalizer
_BN_EPS = 1e-5
_MAX_PACKED = 2048          # max lanes for the packed elementwise intermediates


def _round_up(x, m):
    return ((x + m - 1) // m) * m


def _hw_limits():
    """(row_tile, vmem_limit_bytes) tuned per TPU generation."""
    try:
        vmem_cap = int(getattr(pltpu.get_tpu_info(), "vmem_capacity_bytes",
                               64 * 1024 * 1024))
    except Exception:
        vmem_cap = 64 * 1024 * 1024
    if vmem_cap >= 100 * 1024 * 1024:          # v5e / v6e: 128 MiB VMEM
        return 8192, 96 * 1024 * 1024
    return 4096, 48 * 1024 * 1024              # v7x: 64 MiB per TensorCore


def _choose_row_tile(n, per_row_bytes, align):
    row_tile, vmem_limit = _hw_limits()
    # Cap the tile by (padded) VMEM footprint, leaving headroom for the
    # double-buffered pipeline and compiler temporaries.
    cap = int((0.6 * vmem_limit) // max(per_row_bytes, 1))
    cap = max(align, (cap // align) * align)
    row_tile = max(align, min(row_tile, cap))
    num_tiles = -(-n // row_tile)
    if num_tiles == 1 and n > 2 * align:
        num_tiles = 2                          # keep both v7x TensorCores busy
    tn = _round_up(-(-n // num_tiles), align)
    grid_n = -(-n // tn)
    return tn, grid_n, grid_n * tn, vmem_limit


# ---------------------------------------------------------------------------
# Kernel 1: combined = wavelet(x) + x @ W.T, plus fused per-tile BN statistics.
# Params are lane-packed as (grid_o, 1, in_f*to): lane l = i*to + k holds
# P[o0+k, i], so every VPU/EUP instruction uses full 128-lane width even when
# out_features < 128. No divides on the EUP path (1/scale, translation/scale
# precomputed); mexican-hat constant folded into the wavelet weights.
# ---------------------------------------------------------------------------
def _make_kan_combined_kernel(tn, in_f, to):
    packed = in_f * to
    use_roll = in_f > 1 and packed % 128 == 0 and (in_f & (in_f - 1)) == 0

    def kernel(x_ref, invs_ref, tos_ref, ww_ref, w_ref, o_ref, sum_ref, sq_ref):
        x = x_ref[...]                       # (tn, in_f)  f32
        inv_s = invs_ref[0]                  # (1, packed)  1/scale
        t_s = tos_ref[0]                     # (1, packed)  translation/scale
        ww = ww_ref[0]                       # (1, packed)  coef*wavelet_w
        w = w_ref[0]                         # (1, packed)  weight

        # Pack in_f onto lanes: x_rep[:, i*to + k] = x[:, i]
        if in_f == 1:
            x_rep = jnp.broadcast_to(x, (tn, packed))
        else:
            x_rep = jnp.concatenate(
                [jnp.broadcast_to(x[:, i:i + 1], (tn, to)) for i in range(in_f)],
                axis=1)                      # (tn, packed)

        # Mexican-hat wavelet (constant folded into ww) + linear term,
        # all at full lane width.
        xs = x_rep * inv_s - t_s
        xs2 = xs * xs
        wav = (xs2 - 1.0) * jnp.exp(-0.5 * xs2)
        contrib = wav * ww + x_rep * w       # (tn, packed)

        # Reduce the in_f lane segments of width `to` down to (tn, to).
        if in_f == 1:
            comb = contrib
        elif use_roll:
            # log2(in_f) XLU rolls; every `to`-wide segment ends up holding
            # the full sum, so taking lanes [0:to] is enough.
            s = contrib
            seg = packed
            while seg > to:
                seg //= 2
                s = s + pltpu.roll(s, shift=seg, axis=1)
            comb = s[:, :to]
        else:
            comb = contrib[:, 0:to]
            for i in range(1, in_f):
                comb = comb + contrib[:, i * to:(i + 1) * to]

        o_ref[...] = comb

        # Fused BatchNorm statistics for this tile. No padding mask here:
        # padded rows are corrected on the host (they contribute a constant).
        s1 = jnp.sum(comb, axis=0, keepdims=True)             # (1, to)
        s2 = jnp.sum(comb * comb, axis=0, keepdims=True)      # (1, to)
        sum_ref[...] = jnp.broadcast_to(s1[:, None, :], (1, 8, to))
        sq_ref[...] = jnp.broadcast_to(s2[:, None, :], (1, 8, to))

    return kernel


# ---------------------------------------------------------------------------
# Kernel 2 (2-D input path only): BN apply on a lane-dense flat view.
# ---------------------------------------------------------------------------
def _bn_apply_kernel(c_ref, scale_ref, bias_ref, o_ref):
    o_ref[...] = c_ref[...] * scale_ref[...] + bias_ref[...]


def kan_linear_forward(x, params):
    """KANLinear (mexican_hat) forward with training-mode BatchNorm1d."""
    scale = params["scale"].astype(jnp.float32)
    translation = params["translation"].astype(jnp.float32)
    wavelet_weights = params["wavelet_weights"].astype(jnp.float32)
    weight = params["weight"].astype(jnp.float32)
    gamma = params["bn_weight"].astype(jnp.float32)
    beta = params["bn_bias"].astype(jnp.float32)
    out_f, in_f = weight.shape

    is_4d = x.ndim > 2
    if is_4d:
        if x.ndim != 4:
            raise ValueError("expected 2-D (N, C) or 4-D NCHW input")
        b, c, h, w = x.shape
        if c != in_f:
            raise ValueError(f"channel dim {c} != in_features {in_f}")
        x_flat = jnp.transpose(x, (0, 2, 3, 1)).reshape(-1, c)
    else:
        x_flat = x
    x_flat = x_flat.astype(jnp.float32)
    n = x_flat.shape[0]

    # out_features chunking guard for very wide layers: keeps the (tn, packed)
    # intermediates bounded in VMEM; only chunk while chunks stay 128-aligned.
    to = out_f
    while in_f * to > _MAX_PACKED and to % 256 == 0:
        to //= 2
    grid_o = out_f // to
    packed = in_f * to

    # 2-D path: the lane-dense flat BN view needs tn % (8*reps) == 0 so flat
    # row blocks stay sublane-aligned.
    reps = 128 // math.gcd(out_f, 128)
    flat_cols = out_f * reps                  # lcm(out_f, 128)
    use_flat_bn = (not is_4d) and flat_cols <= 2048
    align = 8 * reps if use_flat_bn else 8

    # Per-row VMEM footprint: lane-padded input/output double buffers plus
    # ~6 live (tn, packed) elementwise intermediates.
    lane = lambda v: _round_up(v, 128)
    per_row_bytes = 4 * (2 * lane(in_f) + 2 * lane(to) + 6 * lane(packed))
    tn, grid_n, n_pad, vmem_limit = _choose_row_tile(n, per_row_bytes, align)

    if n_pad != n:
        x_flat = jnp.pad(x_flat, ((0, n_pad - n), (0, 0)))

    # Wrapper-side (tiny) parameter prep: lane-packed (grid_o, 1, packed).
    def pack(p):   # (out_f, in_f) -> (grid_o, 1, in_f*to); lane l = i*to + k
        return p.reshape(grid_o, to, in_f).transpose(0, 2, 1).reshape(
            grid_o, 1, packed)

    inv_scale = pack(1.0 / scale)
    t_over_s = pack(translation / scale)
    ww_coef = pack(_MH_COEF * wavelet_weights)
    w_packed = pack(weight)

    param_spec = pl.BlockSpec((1, 1, packed), lambda i, o: (o, 0, 0))
    cparams1 = pltpu.CompilerParams(
        dimension_semantics=("parallel", "arbitrary"),
        vmem_limit_bytes=vmem_limit)

    combined, tile_sum, tile_sq = pl.pallas_call(
        _make_kan_combined_kernel(tn, in_f, to),
        out_shape=(
            jax.ShapeDtypeStruct((n_pad, out_f), jnp.float32),
            jax.ShapeDtypeStruct((grid_n, 8, out_f), jnp.float32),
            jax.ShapeDtypeStruct((grid_n, 8, out_f), jnp.float32),
        ),
        grid_spec=pltpu.PrefetchScalarGridSpec(
            num_scalar_prefetch=0,
            grid=(grid_n, grid_o),
            in_specs=[
                pl.BlockSpec((tn, in_f), lambda i, o: (i, 0)),
                param_spec, param_spec, param_spec, param_spec,
            ],
            out_specs=[
                pl.BlockSpec((tn, to), lambda i, o: (i, o)),
                pl.BlockSpec((1, 8, to), lambda i, o: (i, 0, o)),
                pl.BlockSpec((1, 8, to), lambda i, o: (i, 0, o)),
            ],
        ),
        compiler_params=cparams1,
    )(x_flat, inv_scale, t_over_s, ww_coef, w_packed)

    # ---- BatchNorm1d training-mode statistics (host-side, tiny) ------------
    # Zero-padded rows contribute a constant per-channel comb0; correct the
    # summed statistics here instead of masking inside the hot loop.
    xs0 = translation / scale
    wav0 = _MH_COEF * (xs0 * xs0 - 1.0) * jnp.exp(-0.5 * xs0 * xs0)
    comb0 = jnp.sum(wav0 * wavelet_weights, axis=1)            # (out_f,)
    n_extra = float(n_pad - n)
    total = jnp.sum(tile_sum[:, 0, :], axis=0) - n_extra * comb0
    total_sq = jnp.sum(tile_sq[:, 0, :], axis=0) - n_extra * comb0 * comb0
    n_f = jnp.float32(n)
    mean = total / n_f
    # NOTE: E[x^2]-E[x]^2 in f32 (biased var, matching PyTorch's normalization
    # path); adequate at these sizes — switch to a Welford merge for huge N.
    var = jnp.maximum(total_sq / n_f - mean * mean, 0.0)
    inv_std = lax.rsqrt(var + _BN_EPS)
    bn_scale = gamma * inv_std                                 # (out_f,)
    bn_bias = beta - mean * bn_scale
    # TODO(synk): BatchNorm running-mean/var update and eval mode not implemented.

    if is_4d:
        # Fuse the BN affine into the NHWC->NCHW transpose: one XLA fusion,
        # no second Pallas pass / extra HBM round-trip of the (N, out_f) slab.
        y = combined[:n] * bn_scale[None, :] + bn_bias[None, :]
        return y.reshape(b, h, w, out_f).transpose(0, 3, 1, 2)

    # 2-D path: Pallas BN apply on a lane-dense flat view of `combined`.
    if use_flat_bn:
        rows = n_pad // reps
        rb = tn // reps
        c_flat = combined.reshape(rows, flat_cols)
        s_flat = jnp.tile(bn_scale[None, :], (1, reps))
        b_flat = jnp.tile(bn_bias[None, :], (1, reps))
        vec_spec = pl.BlockSpec((1, flat_cols), lambda i: (0, 0))
        cparams2 = pltpu.CompilerParams(dimension_semantics=("parallel",),
                                        vmem_limit_bytes=vmem_limit)
        y = pl.pallas_call(
            _bn_apply_kernel,
            out_shape=jax.ShapeDtypeStruct((rows, flat_cols), jnp.float32),
            grid_spec=pltpu.PrefetchScalarGridSpec(
                num_scalar_prefetch=0,
                grid=(grid_n,),
                in_specs=[pl.BlockSpec((rb, flat_cols), lambda i: (i, 0)),
                          vec_spec, vec_spec],
                out_specs=pl.BlockSpec((rb, flat_cols), lambda i: (i, 0)),
            ),
            input_output_aliases={0: 0},   # reuse the 'combined' HBM buffer
            compiler_params=cparams2,
        )(c_flat, s_flat, b_flat)
        return y.reshape(n_pad, out_f)[:n]

    # Fallback when the flat view is not cleanly expressible.
    return combined[:n] * bn_scale[None, :] + bn_bias[None, :]


def init_params(key, in_features, out_features):
    """Deterministic parameter init mirroring KANLinear.__init__ shapes."""
    k1, k2 = jax.random.split(key)
    # kaiming_uniform_(a=sqrt(5))  =>  U(-1/sqrt(fan_in), 1/sqrt(fan_in))
    bound = 1.0 / math.sqrt(in_features)
    wavelet_weights = jax.random.uniform(
        k1, (out_features, in_features), jnp.float32, -bound, bound)
    weight = jax.random.uniform(
        k2, (out_features, in_features), jnp.float32, -bound, bound)
    return {
        "scale": jnp.ones((out_features, in_features), jnp.float32),
        "translation": jnp.zeros((out_features, in_features), jnp.float32),
        "wavelet_weights": wavelet_weights,
        "weight": weight,
        "bn_weight": jnp.ones((out_features,), jnp.float32),   # BN gamma
        "bn_bias": jnp.zeros((out_features,), jnp.float32),    # BN beta
    }


def _reference(x, params):
    """Pure-JAX reference (mirrors the PyTorch forward) for validation."""
    if x.ndim > 2:
        b, c, h, w = x.shape
        xf = jnp.transpose(x, (0, 2, 3, 1)).reshape(-1, c)
    else:
        xf = x
    xf = xf.astype(jnp.float32)
    xs = (xf[:, None, :] - params["translation"][None]) / params["scale"][None]
    wav = _MH_COEF * (xs ** 2 - 1.0) * jnp.exp(-0.5 * xs ** 2)
    wout = jnp.sum(wav * params["wavelet_weights"][None], axis=2)
    lout = xf @ params["weight"].T
    comb = wout + lout
    mean = comb.mean(axis=0)
    var = jnp.mean((comb - mean) ** 2, axis=0)
    y = (comb - mean) / jnp.sqrt(var + _BN_EPS) * params["bn_weight"] \
        + params["bn_bias"]
    if x.ndim > 2:
        y = y.reshape(b, h, w, -1).transpose(0, 3, 1, 2)
    return y


if __name__ == "__main__":
    in_features = 4
    out_features = 32

    key = jax.random.PRNGKey(0)
    k_param, k_x = jax.random.split(key)
    params = init_params(k_param, in_features, out_features)

    # NCHW input, C == in_features (as the PyTorch forward implies).
    x = jax.random.normal(k_x, (2, in_features, 16, 16), dtype=jnp.float32)

    fwd = jax.jit(kan_linear_forward)
    y = jax.block_until_ready(fwd(x, params))

    y_ref = _reference(x, params)
    assert y.shape == (2, out_features, 16, 16), y.shape
    max_err = float(jnp.max(jnp.abs(y - y_ref)))
    assert jnp.allclose(y, y_ref, rtol=2e-4, atol=2e-4), max_err

    print("KERNEL_OK")
</pallas_src>

<mosaic_0001>
module attributes {stable_mosaic.version = 11 : i64} {
  func.func @kernel(%arg0: i32, %arg1: i32, %arg2: memref<256x4xf32, #tpu.memory_space<vmem>>, %arg3: memref<1x1x128xf32, #tpu.memory_space<vmem>>, %arg4: memref<1x1x128xf32, #tpu.memory_space<vmem>>, %arg5: memref<1x1x128xf32, #tpu.memory_space<vmem>>, %arg6: memref<1x1x128xf32, #tpu.memory_space<vmem>>, %arg7: memref<256x32xf32, #tpu.memory_space<vmem>>, %arg8: memref<1x8x32xf32, #tpu.memory_space<vmem>>, %arg9: memref<1x8x32xf32, #tpu.memory_space<vmem>>) attributes {dimension_semantics = [#tpu.dimension_semantics<parallel>, #tpu.dimension_semantics<arbitrary>], iteration_bounds = array<i64: 2, 1>, scalar_prefetch = 0 : i64, scratch_operands = 0 : i64, tpu.core_type = #tpu.core_type<tc>, window_params = [{transform_indices = @transform_0, window_bounds = array<i64: 256, 4>}, {transform_indices = @transform_1, window_bounds = array<i64: 1, 1, 128>}, {transform_indices = @transform_2, window_bounds = array<i64: 1, 1, 128>}, {transform_indices = @transform_3, window_bounds = array<i64: 1, 1, 128>}, {transform_indices = @transform_4, window_bounds = array<i64: 1, 1, 128>}, {transform_indices = @transform_5, window_bounds = array<i64: 256, 32>}, {transform_indices = @transform_6, window_bounds = array<i64: 1, 8, 32>}, {transform_indices = @transform_7, window_bounds = array<i64: 1, 8, 32>}]} {
    %c0 = arith.constant 0 : index
    %c0_0 = arith.constant 0 : index
    %0 = vector.load %arg2[%c0, %c0_0] : memref<256x4xf32, #tpu.memory_space<vmem>>, vector<256x4xf32>
    %c0_1 = arith.constant 0 : index
    %c0_2 = arith.constant 0 : index
    %c0_3 = arith.constant 0 : index
    %1 = vector.load %arg3[%c0_1, %c0_2, %c0_3] : memref<1x1x128xf32, #tpu.memory_space<vmem>>, vector<1x1x128xf32>
    %2 = vector.shape_cast %1 : vector<1x1x128xf32> to vector<1x128xf32>
    %c0_4 = arith.constant 0 : index
    %c0_5 = arith.constant 0 : index
    %c0_6 = arith.constant 0 : index
    %3 = vector.load %arg4[%c0_4, %c0_5, %c0_6] : memref<1x1x128xf32, #tpu.memory_space<vmem>>, vector<1x1x128xf32>
    %4 = vector.shape_cast %3 : vector<1x1x128xf32> to vector<1x128xf32>
    %c0_7 = arith.constant 0 : index
    %c0_8 = arith.constant 0 : index
    %c0_9 = arith.constant 0 : index
    %5 = vector.load %arg5[%c0_7, %c0_8, %c0_9] : memref<1x1x128xf32, #tpu.memory_space<vmem>>, vector<1x1x128xf32>
    %6 = vector.shape_cast %5 : vector<1x1x128xf32> to vector<1x128xf32>
    %c0_10 = arith.constant 0 : index
    %c0_11 = arith.constant 0 : index
    %c0_12 = arith.constant 0 : index
    %7 = vector.load %arg6[%c0_10, %c0_11, %c0_12] : memref<1x1x128xf32, #tpu.memory_space<vmem>>, vector<1x1x128xf32>
    %8 = vector.shape_cast %7 : vector<1x1x128xf32> to vector<1x128xf32>
    %9 = vector.extract_strided_slice %0 {offsets = [0, 0], sizes = [256, 1], strides = [1, 1]} : vector<256x4xf32> to vector<256x1xf32>
    %10 = vector.shape_cast %9 : vector<256x1xf32> to vector<256x1xf32>
    %11 = vector.broadcast %10 : vector<256x1xf32> to vector<256x32xf32>
    %12 = vector.extract_strided_slice %0 {offsets = [0, 1], sizes = [256, 1], strides = [1, 1]} : vector<256x4xf32> to vector<256x1xf32>
    %13 = vector.shape_cast %12 : vector<256x1xf32> to vector<256x1xf32>
    %14 = vector.broadcast %13 : vector<256x1xf32> to vector<256x32xf32>
    %15 = vector.extract_strided_slice %0 {offsets = [0, 2], sizes = [256, 1], strides = [1, 1]} : vector<256x4xf32> to vector<256x1xf32>
    %16 = vector.shape_cast %15 : vector<256x1xf32> to vector<256x1xf32>
    %17 = vector.broadcast %16 : vector<256x1xf32> to vector<256x32xf32>
    %18 = vector.extract_strided_slice %0 {offsets = [0, 3], sizes = [256, 1], strides = [1, 1]} : vector<256x4xf32> to vector<256x1xf32>
    %19 = vector.shape_cast %18 : vector<256x1xf32> to vector<256x1xf32>
    %20 = vector.broadcast %19 : vector<256x1xf32> to vector<256x32xf32>
    %21 = tpu.concatenate %11, %14, %17, %20 in 1 : vector<256x32xf32>, vector<256x32xf32>, vector<256x32xf32>, vector<256x32xf32> -> vector<256x128xf32>
    %22 = vector.broadcast %2 : vector<1x128xf32> to vector<256x128xf32>
    %23 = arith.mulf %21, %22 : vector<256x128xf32>
    %24 = vector.broadcast %4 : vector<1x128xf32> to vector<256x128xf32>
    %25 = arith.subf %23, %24 : vector<256x128xf32>
    %26 = arith.mulf %25, %25 : vector<256x128xf32>
    %cst = arith.constant 1.000000e+00 : f32
    %27 = vector.broadcast %cst : f32 to vector<256x128xf32>
    %28 = arith.subf %26, %27 : vector<256x128xf32>
    %cst_13 = arith.constant -5.000000e-01 : f32
    %29 = vector.broadcast %cst_13 : f32 to vector<256x128xf32>
    %30 = arith.mulf %29, %26 : vector<256x128xf32>
    %31 = math.exp %30 : vector<256x128xf32>
    %32 = arith.mulf %28, %31 : vector<256x128xf32>
    %33 = vector.broadcast %6 : vector<1x128xf32> to vector<256x128xf32>
    %34 = arith.mulf %32, %33 : vector<256x128xf32>
    %35 = vector.broadcast %8 : vector<1x128xf32> to vector<256x128xf32>
    %36 = arith.mulf %21, %35 : vector<256x128xf32>
    %37 = arith.addf %34, %36 : vector<256x128xf32>
    %c64_i32 = arith.constant 64 : i32
    %38 = tpu.dynamic_rotate %37 by %c64_i32 dim 1 : vector<256x128xf32>, i32 -> vector<256x128xf32>
    %39 = arith.addf %37, %38 : vector<256x128xf32>
    %c32_i32 = arith.constant 32 : i32
    %40 = tpu.dynamic_rotate %39 by %c32_i32 dim 1 : vector<256x128xf32>, i32 -> vector<256x128xf32>
    %41 = arith.addf %39, %40 : vector<256x128xf32>
    %42 = vector.extract_strided_slice %41 {offsets = [0, 0], sizes = [256, 32], strides = [1, 1]} : vector<256x128xf32> to vector<256x32xf32>
    %c0_14 = arith.constant 0 : index
    %c0_15 = arith.constant 0 : index
    %43 = vector.load %arg7[%c0_14, %c0_15] : memref<256x32xf32, #tpu.memory_space<vmem>>, vector<256x32xf32>
    tpu.vector_store %arg7[%c0_14, %c0_15], %42 {strides = array<i32>} : memref<256x32xf32, #tpu.memory_space<vmem>>, vector<256x32xf32>,
    %cst_16 = arith.constant dense<0.000000e+00> : vector<32xf32>
    %44 = vector.multi_reduction <add>, %42, %cst_16 [0] : vector<256x32xf32> to vector<32xf32>
    %45 = vector.shape_cast %44 : vector<32xf32> to vector<1x32xf32>
    %46 = arith.mulf %42, %42 : vector<256x32xf32>
    %cst_17 = arith.constant dense<0.000000e+00> : vector<32xf32>
    %47 = vector.multi_reduction <add>, %46, %cst_17 [0] : vector<256x32xf32> to vector<32xf32>
    %48 = vector.shape_cast %47 : vector<32xf32> to vector<1x32xf32>
    %49 = vector.shape_cast %45 : vector<1x32xf32> to vector<1x1x32xf32>
    %50 = vector.shape_cast %49 : vector<1x1x32xf32> to vector<1x1x32xf32>
    %51 = vector.broadcast %50 : vector<1x1x32xf32> to vector<1x8x32xf32>
    %c0_18 = arith.constant 0 : index
    %c0_19 = arith.constant 0 : index
    %c0_20 = arith.constant 0 : index
    %52 = vector.load %arg8[%c0_18, %c0_19, %c0_20] : memref<1x8x32xf32, #tpu.memory_space<vmem>>, vector<1x8x32xf32>
    tpu.vector_store %arg8[%c0_18, %c0_19, %c0_20], %51 {strides = array<i32>} : memref<1x8x32xf32, #tpu.memory_space<vmem>>, vector<1x8x32xf32>,
    %53 = vector.shape_cast %48 : vector<1x32xf32> to vector<1x1x32xf32>
    %54 = vector.shape_cast %53 : vector<1x1x32xf32> to vector<1x1x32xf32>
    %55 = vector.broadcast %54 : vector<1x1x32xf32> to vector<1x8x32xf32>
    %c0_21 = arith.constant 0 : index
    %c0_22 = arith.constant 0 : index
    %c0_23 = arith.constant 0 : index
    %56 = vector.load %arg9[%c0_21, %c0_22, %c0_23] : memref<1x8x32xf32, #tpu.memory_space<vmem>>, vector<1x8x32xf32>
    tpu.vector_store %arg9[%c0_21, %c0_22, %c0_23], %55 {strides = array<i32>} : memref<1x8x32xf32, #tpu.memory_space<vmem>>, vector<1x8x32xf32>,
    return
  }
  func.func @transform_0(%arg0: i32, %arg1: i32) -> (i32, i32) {
    %c0_i32 = arith.constant 0 : i32
    %c0_i32_0 = arith.constant 0 : i32
    return %arg0, %c0_i32 : i32, i32
  }
  func.func @transform_1(%arg0: i32, %arg1: i32) -> (i32, i32, i32) {
    %c0_i32 = arith.constant 0 : i32
    %c0_i32_0 = arith.constant 0 : i32
    %c0_i32_1 = arith.constant 0 : i32
    return %arg1, %c0_i32, %c0_i32_0 : i32, i32, i32
  }
  func.func @transform_2(%arg0: i32, %arg1: i32) -> (i32, i32, i32) {
    %c0_i32 = arith.constant 0 : i32
    %c0_i32_0 = arith.constant 0 : i32
    %c0_i32_1 = arith.constant 0 : i32
    return %arg1, %c0_i32, %c0_i32_0 : i32, i32, i32
  }
  func.func @transform_3(%arg0: i32, %arg1: i32) -> (i32, i32, i32) {
    %c0_i32 = arith.constant 0 : i32
    %c0_i32_0 = arith.constant 0 : i32
    %c0_i32_1 = arith.constant 0 : i32
    return %arg1, %c0_i32, %c0_i32_0 : i32, i32, i32
  }
  func.func @transform_4(%arg0: i32, %arg1: i32) -> (i32, i32, i32) {
    %c0_i32 = arith.constant 0 : i32
    %c0_i32_0 = arith.constant 0 : i32
    %c0_i32_1 = arith.constant 0 : i32
    return %arg1, %c0_i32, %c0_i32_0 : i32, i32, i32
  }
  func.func @transform_5(%arg0: i32, %arg1: i32) -> (i32, i32) {
    %c0_i32 = arith.constant 0 : i32
    return %arg0, %arg1 : i32, i32
  }
  func.func @transform_6(%arg0: i32, %arg1: i32) -> (i32, i32, i32) {
    %c0_i32 = arith.constant 0 : i32
    %c0_i32_0 = arith.constant 0 : i32
    return %arg0, %c0_i32, %arg1 : i32, i32, i32
  }
  func.func @transform_7(%arg0: i32, %arg1: i32) -> (i32, i32, i32) {
    %c0_i32 = arith.constant 0 : i32
    %c0_i32_0 = arith.constant 0 : i32
    return %arg0, %c0_i32, %arg1 : i32, i32, i32
  }
}

</mosaic_0001>

<bundles_post_ra>
// kernel: kan_linear_forward.1
= control target key start
LH: loop header
LB: loop body
LE: loop exit
PB: predicated region body
PF: predicated region fallthrough
CT: control target
= control target key end

     0   :  { %s2277_s24 = smov 0   ;;  %s2279_s25 = smov 0   ;;  %s3860_s0 = inlined_call_operand.vmem [shape: f32[512,4], index: 0, kind: input, shape index: {}]   ;;  %s3861_s1 = inlined_call_operand.vmem [shape: f32[1,1,128], index: 1, kind: input, shape index: {}]   ;;  %s3862_s2 = inlined_call_operand.vmem [shape: f32[1,1,128], index: 2, kind: input, shape index: {}]   ;;  %s3863_s3 = inlined_call_operand.vmem [shape: f32[1,1,128], index: 3, kind: input, shape index: {}]   ;;  %s3864_s4 = inlined_call_operand.vmem [shape: f32[1,1,128], index: 4, kind: input, shape index: {}]   ;;  %s3865_s5 = inlined_call_operand.vmem [shape: f32[512,32], index: 5, kind: output, shape index: {0}]   ;;  %s3866_s6 = inlined_call_operand.vmem [shape: f32[2,8,32], index: 6, kind: output, shape index: {1}]   ;;  %s3867_s7 = inlined_call_operand.vmem [shape: f32[2,8,32], index: 7, kind: output, shape index: {2}]  }
   0x1   :  { %s2281_s26 = smov 0  }
   0x2 LB: > { %s30_s27 = sadd.s32 1, %s2225_s25  ;;  %p2059_p0 = scmp.ge.s32.totalorder %s2229_s26, 1  ;;  %s2229_s26 = sphi %s2281_s26, %s18_s26   ;;  %s2225_s25 = sphi %s2279_s25, %s3928_s25   ;;  %s2221_s24 = sphi %s2277_s24, %s3927_s24  }
   0x3   : > { %p32_p1 = scmp.ge.s32.totalorder %s30_s27, 2  ;;  %p293_p2 = scmp.lt.s32.totalorder %s2229_s26, 3 }
   0x5   : > { %s3930_s27 = smov (%p32_p1, %s30_s27), 0  ;;  %p294_p3 = pnand %p2059_p0, %p293_p2 }
   0x7   : > { %297 = sbr.rel (%p294_p3) target bundleno = 698 (0x2ba), region = 40 }
   0xe   : > { %s2060_s28 = sshll.u32 %s2221_s24, 5  ;;  %v2231_v0 = vmov 0   ;;  %v2232_v33 = vmov 1   ;;  %v3868_v36 = vmov 2   ;;  %v2234_v59 = vmov 3   ;;  %s2235_s18 = smov 64  }
   0xf   : > { %2135 = vset.pattern.permute.xlu1 %v2231_v0  ;;  %2134 = vset.pattern.permute.xlu0 %v2231_v0  ;;  %p355_p4 = scmp.lt.s32.totalorder %s2060_s28, 63  ;;  %vm975_vm0 = vcmask 261120   ;;  %vm1008_vm1 = vcmask 523264   ;;  %vm1041_vm2 = vcmask 785408   ;;  %s2236_s19 = smov 32  }
  0x10   : > { %p381_p5 = scmp.lt.s32.totalorder %s2221_s24, 1 }
  0x11   : > { %s3932_s28 = smov (!%p355_p4, %s2060_s28), 63 }
  0x12   : > { %s2061_s29 = sshll.u32 %s3932_s28, 3  ;;  %s3934_s24 = smov (!%p381_p5, %s2221_s24), 1 }
  0x13   : > { %s2306_s9 = scalar_lea.vmem %s3860_s0, %s2061_s29  ;;  %s3679_s22 = scalar_lea.vmem %s3865_s5, %s2061_s29 }
  0x14   : > { %v2309_v1 = vld [vmem:[%s2306_s9 + $0x10] sm:$0xff]  ;;  %v2312_v2 = vld [vmem:[%s2306_s9] sm:$0xff]  ;;  %v2317_v3 = vld [vmem:[%s2306_s9 + $0x18] sm:$0xff]  ;;  %s2064_s23 = sshll.u32 %s3934_s24, 3 }
  0x15   : > { %443 = vperm.xlu1 %2135, %v2309_v1   ;;  %433 = vperm.xlu0 %2134, %v2312_v2   ;;  %v2320_v4 = vld [vmem:[%s2306_s9 + $0x8] sm:$0xff]  ;;  %v2328_v6 = vld [vmem:[%s2306_s9 + $0x20] sm:$0xff]  ;;  %v2333_v7 = vld [vmem:[%s2306_s9 + $0x38] sm:$0xff]  ;;  %s387_s30 = scalar_lea.vmem %s3866_s6, %s2064_s23  ;;  %s394_s10 = scalar_lea.vmem %s3867_s7, %s2064_s23 }
  0x16   : > { %v2325_v5 = vld [vmem:[%s2306_s9 + $0x28] sm:$0xff]  ;;  %v2336_v8 = vld [vmem:[%s2306_s9 + $0x30] sm:$0xff]  ;;  %v2344_v10 = vld [vmem:[%s2306_s9 + $0x40] sm:$0xff] }
  0x17   : > { %v2341_v9 = vld [vmem:[%s2306_s9 + $0x48] sm:$0xff]  ;;  %v2349_v11 = vld [vmem:[%s2306_s9 + $0x58] sm:$0xff]  ;;  %v2352_v12 = vld [vmem:[%s2306_s9 + $0x50] sm:$0xff] }
  0x18   : > { %v2357_v13 = vld [vmem:[%s2306_s9 + $0x68] sm:$0xff]  ;;  %v2360_v14 = vld [vmem:[%s2306_s9 + $0x60] sm:$0xff]  ;;  %v2365_v15 = vld [vmem:[%s2306_s9 + $0x78] sm:$0xff] }
  0x19   : > { %448 = vperm.xlu1 %2135, %v2317_v3   ;;  %438 = vperm.xlu0 %2134, %v2320_v4   ;;  %v2368_v16 = vld [vmem:[%s2306_s9 + $0x70] sm:$0xff]  ;;  %v2373_v17 = vld [vmem:[%s2306_s9 + $0x88] sm:$0xff]  ;;  %v2376_v18 = vld [vmem:[%s2306_s9 + $0x80] sm:$0xff] }
  0x1a   : > { %v2381_v19 = vld [vmem:[%s2306_s9 + $0x98] sm:$0xff]  ;;  %v2384_v20 = vld [vmem:[%s2306_s9 + $0x90] sm:$0xff]  ;;  %v2389_v21 = vld [vmem:[%s2306_s9 + $0xa8] sm:$0xff] }
  0x1b   : > { %v2392_v22 = vld [vmem:[%s2306_s9 + $0xa0] sm:$0xff]  ;;  %v2397_v23 = vld [vmem:[%s2306_s9 + $0xb8] sm:$0xff]  ;;  %v2400_v24 = vld [vmem:[%s2306_s9 + $0xb0] sm:$0xff] }
  0x1c   : > { %v2405_v25 = vld [vmem:[%s2306_s9 + $0xc8] sm:$0xff]  ;;  %v2408_v26 = vld [vmem:[%s2306_s9 + $0xc0] sm:$0xff]  ;;  %v2413_v27 = vld [vmem:[%s2306_s9 + $0xd8] sm:$0xff] }
  0x1d   : > { %458 = vperm.xlu1 %2135, %v2325_v5   ;;  %453 = vperm.xlu0 %2134, %v2328_v6   ;;  %v2416_v28 = vld [vmem:[%s2306_s9 + $0xd0] sm:$0xff]  ;;  %v2421_v29 = vld [vmem:[%s2306_s9 + $0xe8] sm:$0xff]  ;;  %v2424_v30 = vld [vmem:[%s2306_s9 + $0xe0] sm:$0xff] }
  0x1e   : > { %v2429_v31 = vld [vmem:[%s2306_s9 + $0xf8] sm:$0xff]  ;;  %v2432_v32 = vld [vmem:[%s2306_s9 + $0xf0] sm:$0xff] }
  0x21   : > { %468 = vperm.xlu1 %2135, %v2333_v7   ;;  %463 = vperm.xlu0 %2134, %v2336_v8  }
  0x25   : > { %478 = vperm.xlu1 %2135, %v2341_v9   ;;  %473 = vperm.xlu0 %2134, %v2344_v10  }
  0x29   : > { %488 = vperm.xlu1 %2135, %v2349_v11   ;;  %483 = vperm.xlu0 %2134, %v2352_v12  }
  0x2d   : > { %498 = vperm.xlu1 %2135, %v2357_v13   ;;  %493 = vperm.xlu0 %2134, %v2360_v14  }
  0x31   : > { %508 = vperm.xlu1 %2135, %v2365_v15   ;;  %503 = vperm.xlu0 %2134, %v2368_v16  }
  0x35   : > { %518 = vperm.xlu1 %2135, %v2373_v17   ;;  %513 = vperm.xlu0 %2134, %v2376_v18  }
  0x39   : > { %528 = vperm.xlu1 %2135, %v2381_v19   ;;  %523 = vperm.xlu0 %2134, %v2384_v20  }
  0x3d   : > { %538 = vperm.xlu1 %2135, %v2389_v21   ;;  %533 = vperm.xlu0 %2134, %v2392_v22  }
  0x41   : > { %548 = vperm.xlu1 %2135, %v2397_v23   ;;  %543 = vperm.xlu0 %2134, %v2400_v24  }
  0x45   : > { %558 = vperm.xlu1 %2135, %v2405_v25   ;;  %553 = vperm.xlu0 %2134, %v2408_v26  }
  0x49   : > { %568 = vperm.xlu1 %2135, %v2413_v27   ;;  %563 = vperm.xlu0 %2134, %v2416_v28  }
  0x4d   : > { %578 = vperm.xlu1 %2135, %v2421_v29   ;;  %573 = vperm.xlu0 %2134, %v2424_v30  }
  0x51   : > { %588 = vperm.xlu1 %2135, %v2429_v31   ;;  %583 = vperm.xlu0 %2134, %v2432_v32  }
  0x55   : > { %2137 = vset.pattern.permute.xlu1 %v2232_v33  ;;  %2136 = vset.pattern.permute.xlu0 %v2232_v33 }
  0x56   : > { %596 = vperm.xlu1 %2137, %v2320_v4   ;;  %592 = vperm.xlu0 %2136, %v2312_v2  }
  0x5a   : > { %600 = vperm.xlu1 %2137, %v2309_v1   ;;  %604 = vperm.xlu0 %2136, %v2317_v3  }
  0x5e   : > { %608 = vperm.xlu1 %2137, %v2328_v6   ;;  %612 = vperm.xlu0 %2136, %v2325_v5  }
  0x62   : > { %616 = vperm.xlu1 %2137, %v2336_v8   ;;  %620 = vperm.xlu0 %2136, %v2333_v7  }
  0x66   : > { %624 = vperm.xlu1 %2137, %v2344_v10   ;;  %628 = vperm.xlu0 %2136, %v2341_v9  }
  0x6a   : > { %632 = vperm.xlu1 %2137, %v2352_v12   ;;  %636 = vperm.xlu0 %2136, %v2349_v11  }
  0x6e   : > { %640 = vperm.xlu1 %2137, %v2360_v14   ;;  %644 = vperm.xlu0 %2136, %v2357_v13  }
  0x72   : > { %648 = vperm.xlu1 %2137, %v2368_v16   ;;  %652 = vperm.xlu0 %2136, %v2365_v15  }
  0x76   : > { %656 = vperm.xlu1 %2137, %v2376_v18   ;;  %660 = vperm.xlu0 %2136, %v2373_v17  }
  0x7a   : > { %664 = vperm.xlu1 %2137, %v2384_v20   ;;  %668 = vperm.xlu0 %2136, %v2381_v19  }
  0x7e   : > { %672 = vperm.xlu1 %2137, %v2392_v22   ;;  %676 = vperm.xlu0 %2136, %v2389_v21  }
  0x82   : > { %680 = vperm.xlu1 %2137, %v2400_v24   ;;  %684 = vperm.xlu0 %2136, %v2397_v23  }
  0x86   : > { %688 = vperm.xlu1 %2137, %v2408_v26   ;;  %692 = vperm.xlu0 %2136, %v2405_v25  }
  0x8a   : > { %696 = vperm.xlu1 %2137, %v2416_v28   ;;  %700 = vperm.xlu0 %2136, %v2413_v27  }
  0x8e   : > { %704 = vperm.xlu1 %2137, %v2424_v30   ;;  %708 = vperm.xlu0 %2136, %v2421_v29  }
  0x92   : > { %712 = vperm.xlu1 %2137, %v2432_v32   ;;  %716 = vperm.xlu0 %2136, %v2429_v31  }
  0x94   : > { %v2468_v34 = vpop.permute.xlu1 %443  ;;  %v2470_v35 = vpop.permute.xlu0 %433 }
  0x96   : > { %2138 = vset.pattern.permute.xlu1 %v3868_v36  ;;  %2139 = vset.pattern.permute.xlu0 %v3868_v36 }
  0x97   : > { %720 = vperm.xlu1 %2138, %v2312_v2   ;;  %724 = vperm.xlu0 %2139, %v2320_v4  }
  0x98   : > { %v2476_v37 = vpop.permute.xlu1 %448  ;;  %v2478_v38 = vpop.permute.xlu0 %438 }
  0x9b   : > { %728 = vperm.xlu1 %2138, %v2309_v1   ;;  %736 = vperm.xlu0 %2139, %v2328_v6  }
  0x9c   : > { %v2482_v39 = vpop.permute.xlu1 %458  ;;  %v2484_v40 = vpop.permute.xlu0 %453 }
  0x9f   : > { %732 = vperm.xlu1 %2138, %v2317_v3   ;;  %744 = vperm.xlu0 %2139, %v2336_v8  }
  0xa0   : > { %v2488_v41 = vpop.permute.xlu1 %468  ;;  %v2490_v42 = vpop.permute.xlu0 %463 }
  0xa3   : > { %740 = vperm.xlu1 %2138, %v2325_v5   ;;  %752 = vperm.xlu0 %2139, %v2344_v10  }
  0xa4   : > { %v2494_v43 = vpop.permute.xlu1 %478  ;;  %v2496_v44 = vpop.permute.xlu0 %473 }
  0xa7   : > { %748 = vperm.xlu1 %2138, %v2333_v7   ;;  %760 = vperm.xlu0 %2139, %v2352_v12  }
  0xa8   : > { %v2500_v45 = vpop.permute.xlu1 %488  ;;  %v2502_v46 = vpop.permute.xlu0 %483 }
  0xab   : > { %756 = vperm.xlu1 %2138, %v2341_v9   ;;  %768 = vperm.xlu0 %2139, %v2360_v14  }
  0xac   : > { %v2506_v47 = vpop.permute.xlu1 %498  ;;  %v2508_v48 = vpop.permute.xlu0 %493 }
  0xaf   : > { %764 = vperm.xlu1 %2138, %v2349_v11   ;;  %776 = vperm.xlu0 %2139, %v2368_v16  }
  0xb0   : > { %v2512_v49 = vpop.permute.xlu1 %508  ;;  %v2514_v50 = vpop.permute.xlu0 %503 }
  0xb3   : > { %772 = vperm.xlu1 %2138, %v2357_v13   ;;  %784 = vperm.xlu0 %2139, %v2376_v18  }
  0xb4   : > { %v2518_v51 = vpop.permute.xlu1 %518  ;;  %v2520_v52 = vpop.permute.xlu0 %513 }
  0xb7   : > { %780 = vperm.xlu1 %2138, %v2365_v15   ;;  %792 = vperm.xlu0 %2139, %v2384_v20  }
  0xb8   : > { %v2524_v53 = vpop.permute.xlu1 %528  ;;  %v2526_v54 = vpop.permute.xlu0 %523 }
  0xbb   : > { %788 = vperm.xlu1 %2138, %v2373_v17   ;;  %800 = vperm.xlu0 %2139, %v2392_v22  }
  0xbc   : > { %v2530_v55 = vpop.permute.xlu1 %538  ;;  %v2532_v56 = vpop.permute.xlu0 %533 }
  0xbf   : > { %796 = vperm.xlu1 %2138, %v2381_v19   ;;  %808 = vperm.xlu0 %2139, %v2400_v24  }
  0xc0   : > { %v2536_v57 = vpop.permute.xlu1 %548  ;;  %v2538_v58 = vpop.permute.xlu0 %543 }
  0xc3   : > { %804 = vperm.xlu1 %2138, %v2389_v21   ;;  %2140 = vset.pattern.permute.xlu0 %v2234_v59 }
  0xc4   : > { %v2541_v60 = vpop.permute.xlu1 %558  ;;  %848 = vperm.xlu0 %2140, %v2312_v2   ;;  %v2544_v61 = vpop.permute.xlu0 %553 }
  0xc5   : > { %3870 = vst [vmem:[#allocation2_spill] sm:$0xff] %v2541_v60 }
  0xc7   : > { %812 = vperm.xlu1 %2138, %v2397_v23  }
  0xc8   : > { %v2547_v62 = vpop.permute.xlu1 %568  ;;  %860 = vperm.xlu0 %2140, %v2317_v3   ;;  %v2550_v63 = vpop.permute.xlu0 %563 }
  0xc9   : > { %3871 = vst [vmem:[#allocation3_spill] sm:$0xff] %v2547_v62  ;;  %3872 = vst [vmem:[#allocation4_spill] sm:$0xff] %v2550_v63 }
  0xcb   : > { %2141 = vset.pattern.permute.xlu1 %v2234_v59 }
  0xcc   : > { %v2552_v0 = vpop.permute.xlu1 %578  ;;  %852 = vperm.xlu1 %2141, %v2320_v4   ;;  %868 = vperm.xlu0 %2140, %v2325_v5   ;;  %v2556_v33 = vpop.permute.xlu0 %573 }
  0xcd   : > { %3873 = vst [vmem:[#allocation5_spill] sm:$0xff] %v2552_v0  ;;  %3874 = vst [vmem:[#allocation6_spill] sm:$0xff] %v2556_v33 }
  0xd0   : > { %v2558_v2 = vpop.permute.xlu1 %588  ;;  %856 = vperm.xlu1 %2141, %v2309_v1   ;;  %876 = vperm.xlu0 %2140, %v2333_v7   ;;  %v2562_v36 = vpop.permute.xlu0 %583 }
  0xd1   : > { %3875 = vst [vmem:[#allocation7_spill] sm:$0xff] %v2558_v2  ;;  %3876 = vst [vmem:[#allocation8_spill] sm:$0xff] %v2562_v36 }
  0xd4   : > { %864 = vperm.xlu1 %2141, %v2328_v6   ;;  %884 = vperm.xlu0 %2140, %v2341_v9  }
  0xd5   : > { %v2566_v3 = vpop.permute.xlu1 %596  ;;  %v2568_v59 = vpop.permute.xlu0 %592 }
  0xd8   : > { %872 = vperm.xlu1 %2141, %v2336_v8   ;;  %892 = vperm.xlu0 %2140, %v2349_v11  }
  0xd9   : > { %v2572_v4 = vpop.permute.xlu1 %600  ;;  %v2574_v5 = vpop.permute.xlu0 %604 }
  0xdc   : > { %880 = vperm.xlu1 %2141, %v2344_v10   ;;  %900 = vperm.xlu0 %2140, %v2357_v13  }
  0xdd   : > { %v2578_v1 = vpop.permute.xlu1 %608  ;;  %v2580_v6 = vpop.permute.xlu0 %612 }
  0xe0   : > { %888 = vperm.xlu1 %2141, %v2352_v12   ;;  %908 = vperm.xlu0 %2140, %v2365_v15  }
  0xe1   : > { %v2584_v7 = vpop.permute.xlu1 %616  ;;  %v2586_v8 = vpop.permute.xlu0 %620 }
  0xe4   : > { %896 = vperm.xlu1 %2141, %v2360_v14   ;;  %916 = vperm.xlu0 %2140, %v2373_v17  }
  0xe5   : > { %v2590_v9 = vpop.permute.xlu1 %624  ;;  %v2592_v10 = vpop.permute.xlu0 %628 }
  0xe8   : > { %904 = vperm.xlu1 %2141, %v2368_v16   ;;  %924 = vperm.xlu0 %2140, %v2381_v19  }
  0xe9   : > { %v2596_v11 = vpop.permute.xlu1 %632  ;;  %v2598_v12 = vpop.permute.xlu0 %636 }
  0xec   : > { %912 = vperm.xlu1 %2141, %v2376_v18   ;;  %932 = vperm.xlu0 %2140, %v2389_v21   ;;  %v3877_v21 = vmov 2  }
  0xed   : > { %v2602_v13 = vpop.permute.xlu1 %640  ;;  %v2604_v14 = vpop.permute.xlu0 %644 }
  0xf0   : > { %920 = vperm.xlu1 %2141, %v2384_v20   ;;  %940 = vperm.xlu0 %2140, %v2397_v23  }
  0xf1   : > { %v2608_v15 = vpop.permute.xlu1 %648  ;;  %v2610_v16 = vpop.permute.xlu0 %652 }
  0xf4   : > { %928 = vperm.xlu1 %2141, %v2392_v22   ;;  %944 = vperm.xlu0 %2140, %v2408_v26  }
  0xf5   : > { %v2614_v17 = vpop.permute.xlu1 %656  ;;  %v2616_v18 = vpop.permute.xlu0 %660 }
  0xf8   : > { %936 = vperm.xlu1 %2141, %v2400_v24   ;;  %948 = vperm.xlu0 %2140, %v2405_v25  }
  0xf9   : > { %v2620_v19 = vpop.permute.xlu1 %664  ;;  %v2622_v20 = vpop.permute.xlu0 %668 }
  0xfc   : > { %2142 = vset.pattern.permute.xlu1 %v3877_v21  ;;  %952 = vperm.xlu0 %2140, %v2416_v28  }
  0xfd   : > { %v2626_v23 = vpop.permute.xlu1 %672  ;;  %816 = vperm.xlu1 %2142, %v2408_v26   ;;  %v2629_v22 = vpop.permute.xlu0 %676 }
 0x100   : > { %956 = vperm.xlu0 %2140, %v2413_v27  }
 0x101   : > { %v2632_v2 = vpop.permute.xlu1 %680  ;;  %820 = vperm.xlu1 %2142, %v2405_v25   ;;  %v2635_v24 = vpop.permute.xlu0 %684 }
 0x104   : > { %960 = vperm.xlu0 %2140, %v2424_v30  }
 0x105   : > { %v2638_v36 = vpop.permute.xlu1 %688  ;;  %824 = vperm.xlu1 %2142, %v2416_v28   ;;  %v2641_v21 = vpop.permute.xlu0 %692 }
 0x108   : > { %964 = vperm.xlu0 %2140, %v2421_v29  }
 0x109   : > { %v2644_v26 = vpop.permute.xlu1 %696  ;;  %828 = vperm.xlu1 %2142, %v2413_v27   ;;  %v2647_v0 = vpop.permute.xlu0 %700 }
 0x10a   : > { %3878 = vst [vmem:[#allocation9_spill] sm:$0xff] %v2644_v26  ;;  %3879 = vst [vmem:[#allocation10_spill] sm:$0xff] %v2647_v0 }
 0x10c   : > { %968 = vperm.xlu0 %2140, %v2432_v32  }
 0x10d   : > { %v2650_v25 = vpop.permute.xlu1 %704  ;;  %832 = vperm.xlu1 %2142, %v2424_v30   ;;  %v2653_v33 = vpop.permute.xlu0 %708 }
 0x10e   : > { %3880 = vst [vmem:[#allocation11_spill] sm:$0xff] %v2650_v25  ;;  %3881 = vst [vmem:[#allocation12_spill] sm:$0xff] %v2653_v33 }
 0x110   : > { %972 = vperm.xlu0 %2140, %v2429_v31  }
 0x111   : > { %v2656_v28 = vpop.permute.xlu1 %712  ;;  %836 = vperm.xlu1 %2142, %v2421_v29   ;;  %v2659_v62 = vpop.permute.xlu0 %716 }
 0x112   : > { %3882 = vst [vmem:[#allocation13_spill] sm:$0xff] %v2656_v28  ;;  %3883 = vst [vmem:[#allocation14_spill] sm:$0xff] %v2659_v62 }
 0x115   : > { %840 = vperm.xlu1 %2142, %v2432_v32  }
 0x116   : > { %v721_v27 = vpop.permute.xlu1 %720  ;;  %v2662_v0 = vpop.permute.xlu0 %724 }
 0x117   : > { %3884 = vst [vmem:[#allocation15_spill] sm:$0xff] %v2662_v0 }
 0x119   : > { %844 = vperm.xlu1 %2142, %v2429_v31  }
 0x11a   : > { %v2665_v25 = vpop.permute.xlu1 %728  ;;  %v2667_v30 = vpop.permute.xlu0 %736 }
 0x11b   : > { %3885 = vst [vmem:[#allocation16_spill] sm:$0xff] %v2665_v25  ;;  %3886 = vst [vmem:[#allocation17_spill] sm:$0xff] %v2667_v30 }
 0x11e   : > { %v733_v33 = vpop.permute.xlu1 %732  ;;  %v2669_v63 = vpop.permute.xlu0 %744 }
 0x11f   : > { %3887 = vst [vmem:[#allocation18_spill] sm:$0xff] %v2669_v63 }
 0x122   : > { %v2671_v26 = vpop.permute.xlu1 %740  ;;  %v2673_v28 = vpop.permute.xlu0 %752 }
 0x123   : > { %3888 = vst [vmem:[#allocation19_spill] sm:$0xff] %v2671_v26  ;;  %3889 = vst [vmem:[#allocation20_spill] sm:$0xff] %v2673_v28 }
 0x126   : > { %v2675_v29 = vpop.permute.xlu1 %748  ;;  %v2677_v62 = vpop.permute.xlu0 %760 }
 0x127   : > { %3890 = vst [vmem:[#allocation21_spill] sm:$0xff] %v2675_v29 }
 0x12a   : > { %v2679_v32 = vpop.permute.xlu1 %756  ;;  %v2681_v0 = vpop.permute.xlu0 %768 }
 0x12b   : > { %3891 = vst [vmem:[#allocation22_spill] sm:$0xff] %v2679_v32  ;;  %3892 = vst [vmem:[#allocation23_spill] sm:$0xff] %v2681_v0 }
 0x12e   : > { %v2683_v31 = vpop.permute.xlu1 %764  ;;  %v2685_v25 = vpop.permute.xlu0 %776 }
 0x12f   : > { %3893 = vst [vmem:[#allocation24_spill] sm:$0xff] %v2685_v25  ;;  %v977_v25 = vsel %vm975_vm0, %v2478_v38, %v2566_v3  ;;  %v981_v38 = vsel %vm975_vm0, %v2482_v39, %v2580_v6  ;;  %v986_v39 = vsel %vm975_vm0, %v2502_v46, %v2596_v11  ;;  %v990_v46 = vsel %vm975_vm0, %v2514_v50, %v2608_v15  ;;  %v2771_v50 = vld [vmem:[%s3862_s2] ss:$0 sm:$0xff]  ;;  %v3905_v15 = vld [vmem:[#allocation12_spill] sm:$0xff] }
 0x132   : > { %v2687_v30 = vpop.permute.xlu1 %772  ;;  %v2689_v60 = vpop.permute.xlu0 %784 }
 0x136   : > { %v2691_v63 = vpop.permute.xlu1 %780  ;;  %v2693_v26 = vpop.permute.xlu0 %792 }
 0x137   : > { %3894 = vst [vmem:[#allocation25_spill] sm:$0xff] %v2691_v63  ;;  %v976_v63 = vsel %vm975_vm0, %v2470_v35, %v2568_v59  ;;  %v982_v35 = vsel %vm975_vm0, %v2490_v42, %v2584_v7  ;;  %v987_v42 = vsel %vm975_vm0, %v2500_v45, %v2598_v12  ;;  %v991_v45 = vsel %vm975_vm0, %v2512_v49, %v2610_v16  ;;  %v3903_v12 = vld [vmem:[#allocation11_spill] sm:$0xff]  ;;  %v3906_v16 = vld [vmem:[#allocation5_spill] sm:$0xff] }
 0x13a   : > { %v2695_v28 = vpop.permute.xlu1 %788  ;;  %v2697_v29 = vpop.permute.xlu0 %800 }
 0x13b   : > { %3895 = vst [vmem:[#allocation26_spill] sm:$0xff] %v2695_v28  ;;  %v978_v28 = vsel %vm975_vm0, %v2468_v34, %v2572_v4  ;;  %v983_v34 = vsel %vm975_vm0, %v2488_v41, %v2586_v8  ;;  %v988_v41 = vsel %vm975_vm0, %v2508_v48, %v2602_v13  ;;  %v1009_v48 = vsel %vm1008_vm1, %v976_v63, %v721_v27  ;;  %v3899_v8 = vld [vmem:[#allocation9_spill] sm:$0xff]  ;;  %v3904_v13 = vld [vmem:[#allocation6_spill] sm:$0xff] }
 0x13c   : > { %v992_v4 = vsel %vm975_vm0, %v2520_v52, %v2614_v17  ;;  %v995_v52 = vsel %vm975_vm0, %v2524_v53, %v2622_v20  ;;  %v2795_v53 = vsel %vm975_vm0, %v2536_v57, %v2635_v24  ;;  %v3902_v57 = vld [vmem:[#allocation3_spill] sm:$0xff]  ;;  %v2829_v17 = vsel %vm975_vm0, %v3906_v16, %v3905_v15  ;;  %v3910_v24 = vld [vmem:[#allocation16_spill] sm:$0xff] }
 0x13e   : > { %v2699_v32 = vpop.permute.xlu1 %796  ;;  %v2701_v0 = vpop.permute.xlu0 %808 }
 0x13f   : > { %3896 = vst [vmem:[#allocation27_spill] sm:$0xff] %v2699_v32  ;;  %3897 = vst [vmem:[#allocation28_spill] sm:$0xff] %v2701_v0  ;;  %v979_v32 = vsel %vm975_vm0, %v2476_v37, %v2574_v5  ;;  %v980_v0 = vsel %vm975_vm0, %v2484_v40, %v2578_v1  ;;  %v984_v37 = vsel %vm975_vm0, %v2496_v44, %v2590_v9  ;;  %v2747_v44 = vld [vmem:[%s3861_s1] ss:$0 sm:$0xff]  ;;  %v3900_v9 = vld [vmem:[#allocation4_spill] sm:$0xff] }
 0x140   : > { %v985_v40 = vsel %vm975_vm0, %v2494_v43, %v2592_v10  ;;  %v989_v43 = vsel %vm975_vm0, %v2506_v47, %v2604_v14  ;;  %v993_v5 = vsel %vm975_vm0, %v2518_v51, %v2616_v18  ;;  %v994_v47 = vsel %vm975_vm0, %v2526_v54, %v2620_v19  ;;  %v3907_v18 = vld [vmem:[#allocation13_spill] sm:$0xff]  ;;  %v3908_v19 = vld [vmem:[#allocation8_spill] sm:$0xff] }
 0x141   : > { %v996_v51 = vsel %vm975_vm0, %v2532_v56, %v2626_v23  ;;  %v2785_v54 = vsel %vm975_vm0, %v2530_v55, %v2629_v22  ;;  %v998_v1 = vsel %vm975_vm0, %v2538_v58, %v2632_v2  ;;  %v2800_v56 = vsel %vm975_vm0, %v2544_v61, %v2638_v36  ;;  %v3898_v55 = vld [vmem:[#allocation2_spill] sm:$0xff]  ;;  %v3909_v23 = vld [vmem:[#allocation15_spill] sm:$0xff] }
 0x142   : > { %v2742_v3 = vpop.permute.xlu1 %804  ;;  %v2805_v6 = vsel %vm975_vm0, %v3898_v55, %v2641_v21  ;;  %v2812_v58 = vsel %vm975_vm0, %v3900_v9, %v3899_v8  ;;  %v3901_v2 = vld [vmem:[#allocation10_spill] sm:$0xff]  ;;  %v1012_v36 = vsel %vm1008_vm1, %v979_v32, %v733_v33  ;;  %v2824_v14 = vsel %vm975_vm0, %v3904_v13, %v3903_v12  ;;  %v3913_v8 = vld [vmem:[#allocation19_spill] sm:$0xff] }
 0x143   : > { %v849_v59 = vpop.permute.xlu0 %848  ;;  %v2817_v10 = vsel %vm975_vm0, %v3902_v57, %v3901_v2  ;;  %v2834_v20 = vsel %vm975_vm0, %v3908_v19, %v3907_v18  ;;  %v1010_v22 = vsel %vm1008_vm1, %v977_v25, %v3909_v23  ;;  %v1011_v21 = vsel %vm1008_vm1, %v978_v28, %v3910_v24  ;;  %v3914_v2 = vld [vmem:[#allocation20_spill] sm:$0xff]  ;;  %v3915_v28 = vld [vmem:[#allocation21_spill] sm:$0xff]  ;;  %v3916_v12 = vld [vmem:[#allocation22_spill] sm:$0xff] }
 0x144   : > { %v2774_v49 = vsel %vm1041_vm2, %v1009_v48, %v849_v59  ;;  %v3911_v48 = vld [vmem:[#allocation17_spill] sm:$0xff]  ;;  %v1014_v9 = vsel %vm1008_vm1, %v981_v38, %v3913_v8  ;;  %v2857_v25 = vsel %vm1008_vm1, %v984_v37, %v3914_v2  ;;  %v1016_v57 = vsel %vm1008_vm1, %v983_v34, %v3915_v28  ;;  %v3917_v13 = vld [vmem:[#allocation23_spill] sm:$0xff]  ;;  %v3918_v19 = vld [vmem:[#allocation24_spill] sm:$0xff] }
 0x145   : > { %v1080_v63 = vmul.f32 %v2747_v44, %v2774_v49  ;;  %v1013_v59 = vsel %vm1008_vm1, %v980_v0, %v3911_v48  ;;  %v1018_v38 = vsel %vm1008_vm1, %v985_v40, %v3916_v12  ;;  %v2871_v37 = vsel %vm1008_vm1, %v988_v41, %v3917_v13 }
 0x146   : > { %v2807_v7 = vpop.permute.xlu1 %812  ;;  %v2886_v40 = vsel %vm1008_vm1, %v990_v46, %v3918_v19  ;;  %v2890_v41 = vsel %vm1008_vm1, %v989_v43, %v2687_v30  ;;  %v2894_v23 = vsel %vm1008_vm1, %v992_v4, %v2689_v60  ;;  %v2906_v30 = vsel %vm1008_vm1, %v994_v47, %v2693_v26  ;;  %v3921_v26 = vld [vmem:[#allocation27_spill] sm:$0xff] }
 0x147   : > { %v1118_v61 = vsub.f32 %v1080_v63, %v2771_v50  ;;  %v861_v11 = vpop.permute.xlu0 %860  ;;  %v3912_v63 = vld [vmem:[#allocation18_spill] sm:$0xff]  ;;  %v2920_v28 = vsel %vm1008_vm1, %v996_v51, %v2697_v29  ;;  %v2924_v47 = vsel %vm1008_vm1, %v995_v52, %v3921_v26 }
 0x148   : > { %v2837_v33 = vsel %vm1041_vm2, %v1012_v36, %v861_v11  ;;  %v2851_v55 = vsel %vm1008_vm1, %v982_v35, %v3912_v63  ;;  %v2863_v36 = vsel %vm1008_vm1, %v986_v39, %v2677_v62  ;;  %v2879_v62 = vsel %vm1008_vm1, %v987_v42, %v2683_v31  ;;  %v3919_v42 = vld [vmem:[#allocation25_spill] sm:$0xff]  ;;  %v3920_v63 = vld [vmem:[#allocation26_spill] sm:$0xff] }
 0x149   : > { %v2843_v27 = vmul.f32 %v1118_v61, %v1118_v61  ;;  %v1083_v32 = vmul.f32 %v2747_v44, %v2837_v33 }
 0x14b   : > { %v1214_v0 = vmul.f32 -0.5, %v2843_v27  ;;  %v1121_v61 = vsub.f32 %v1083_v32, %v2771_v50  ;;  %v853_v35 = vpop.permute.xlu1 %852  ;;  %v869_v11 = vpop.permute.xlu0 %868 }
 0x14c   : > { %v1043_v15 = vsel %vm1041_vm2, %v1010_v22, %v853_v35  ;;  %v2875_v34 = vsel %vm1041_vm2, %v1014_v9, %v869_v11  ;;  %v2900_v22 = vsel %vm1008_vm1, %v991_v45, %v3919_v42  ;;  %v2913_v45 = vsel %vm1008_vm1, %v993_v5, %v3920_v63 }
 0x14d   : > { %v1246_v39 = vmul.f32 1.442695, %v1214_v0  ;;  %v2881_v16 = vmul.f32 %v1121_v61, %v1121_v61  ;;  %v1081_v18 = vmul.f32 %v2747_v44, %v1043_v15  ;;  %v1085_v31 = vmul.f32 %v2747_v44, %v2875_v34  ;;  %v3922_v0 = vld [vmem:[#allocation28_spill] sm:$0xff] }
 0x14e   : > { %v2936_v61 = vsel %vm1008_vm1, %v998_v1, %v3922_v0  ;;  %v2943_v11 = vsel %vm1008_vm1, %v2785_v54, %v2742_v3  ;;  %v2956_v42 = vsel %vm1008_vm1, %v2795_v53, %v2807_v7  ;;  %v2068_v53 = vadd.f32 -1.0, %v2843_v27 }
 0x14f   : > { %2143 = vpow2.f32 %v1246_v39  ;;  %v1217_v24 = vmul.f32 -0.5, %v2881_v16  ;;  %v1119_v46 = vsub.f32 %v1081_v18, %v2771_v50  ;;  %v857_v32 = vpop.permute.xlu1 %856  ;;  %v877_v48 = vpop.permute.xlu0 %876  ;;  %v1123_v60 = vsub.f32 %v1085_v31, %v2771_v50 }
 0x150   : > { %v1044_v43 = vsel %vm1041_vm2, %v1011_v21, %v857_v32  ;;  %v1049_v4 = vsel %vm1041_vm2, %v1016_v57, %v877_v48  ;;  %v2929_v21 = vld [vmem:[%s3864_s4] ss:$0 sm:$0xff] }
 0x151   : > { %v1252_v8 = vmul.f32 1.442695, %v1217_v24  ;;  %v2915_v9 = vmul.f32 %v1119_v46, %v1119_v46  ;;  %v1082_v2 = vmul.f32 %v2747_v44, %v1044_v43  ;;  %v2931_v5 = vmul.f32 %v1123_v60, %v1123_v60 }
 0x152   : > { %v1087_v57 = vmul.f32 %v2747_v44, %v1049_v4  ;;  %v1386_v1 = vmul.f32 %v2929_v21, %v2774_v49  ;;  %v2979_v63 = vmul.f32 %v2929_v21, %v1043_v15  ;;  %v2993_v15 = vmul.f32 %v2929_v21, %v2875_v34 }
 0x153   : > { %2145 = vpow2.f32 %v1252_v8  ;;  %v1215_v29 = vmul.f32 -0.5, %v2915_v9  ;;  %v1120_v51 = vsub.f32 %v1082_v2, %v2771_v50  ;;  %v865_v52 = vpop.permute.xlu1 %864  ;;  %v885_v35 = vpop.permute.xlu0 %884  ;;  %v1219_v12 = vmul.f32 -0.5, %v2931_v5 }
 0x154   : > { %v1125_v13 = vsub.f32 %v1087_v57, %v2771_v50  ;;  %v1046_v39 = vsel %vm1041_vm2, %v1013_v59, %v865_v52  ;;  %v2961_v24 = vsel %vm1041_vm2, %v1018_v38, %v885_v35  ;;  %v2965_v59 = vmul.f32 %v2929_v21, %v2837_v33  ;;  %v2976_v33 = vld [vmem:[%s3863_s3] ss:$0 sm:$0xff] }
 0x155   : > { %v1248_v18 = vmul.f32 1.442695, %v1215_v29  ;;  %v2950_v19 = vmul.f32 %v1120_v51, %v1120_v51  ;;  %v1084_v31 = vmul.f32 %v2747_v44, %v1046_v39  ;;  %v1256_v3 = vmul.f32 1.442695, %v1219_v12 }
 0x156   : > { %v2958_v54 = vmul.f32 %v1125_v13, %v1125_v13  ;;  %v1089_v38 = vmul.f32 %v2747_v44, %v2961_v24  ;;  %v2071_v51 = vadd.f32 -1.0, %v2881_v16  ;;  %v2998_v13 = vmul.f32 %v2929_v21, %v1044_v43 }
 0x157   : > { %2147 = vpow2.f32 %v1248_v18  ;;  %v1216_v49 = vmul.f32 -0.5, %v2950_v19  ;;  %v1122_v46 = vsub.f32 %v1084_v31, %v2771_v50  ;;  %v873_v32 = vpop.permute.xlu1 %872  ;;  %v893_v48 = vpop.permute.xlu0 %892  ;;  %v3002_v16 = vmul.f32 %v2929_v21, %v1049_v4 }
 0x158   : > { %2149 = vpow2.f32 %v1256_v3  ;;  %v1221_v7 = vmul.f32 -0.5, %v2958_v54  ;;  %v2985_v27 = vsel %vm1041_vm2, %v2851_v55, %v873_v32  ;;  %v1127_v0 = vsub.f32 %v1089_v38, %v2771_v50 }
 0x159   : > { %v2144_v60 = vpop.eup %2143  ;;  %v1250_v8 = vmul.f32 1.442695, %v1216_v49  ;;  %v2981_v2 = vmul.f32 %v1122_v46, %v1122_v46  ;;  %v1086_v29 = vmul.f32 %v2747_v44, %v2985_v27  ;;  %v1053_v34 = vsel %vm1041_vm2, %v2879_v62, %v893_v48 }
 0x15a   : > { %v1310_v26 = vmul.f32 %v2144_v60, %v2068_v53  ;;  %v1260_v57 = vmul.f32 1.442695, %v1221_v7  ;;  %v1159_v18 = vmul.f32 %v1127_v0, %v1127_v0  ;;  %v2069_v7 = vadd.f32 -1.0, %v2915_v9 }
 0x15b   : > { %2151 = vpow2.f32 %v1250_v8  ;;  %v1218_v52 = vmul.f32 -0.5, %v2981_v2  ;;  %v881_v35 = vpop.permute.xlu1 %880  ;;  %v901_v12 = vpop.permute.xlu0 %900  ;;  %v1124_v31 = vsub.f32 %v1086_v29, %v2771_v50  ;;  %v1091_v38 = vmul.f32 %v2747_v44, %v1053_v34 }
 0x15c   : > { %v1348_v55 = vmul.f32 %v2976_v33, %v1310_v26  ;;  %v3008_v46 = vsel %vm1041_vm2, %v2857_v25, %v881_v35  ;;  %2153 = vpow2.f32 %v1260_v57  ;;  %v1223_v43 = vmul.f32 -0.5, %v1159_v18 }
 0x15d   : > { %v2146_v3 = vpop.eup %2145  ;;  %v1254_v49 = vmul.f32 1.442695, %v1218_v52  ;;  %v3014_v53 = vsel %vm1041_vm2, %v2890_v41, %v901_v12  ;;  %v3017_v4 = vmul.f32 %v1124_v31, %v1124_v31  ;;  %v2073_v25 = vadd.f32 -1.0, %v2931_v5 }
 0x15e   : > { %v3010_v32 = vadd.f32 %v1386_v1, %v1348_v55  ;;  %v1313_v60 = vmul.f32 %v2146_v3, %v2071_v51  ;;  %v1264_v1 = vmul.f32 1.442695, %v1223_v43  ;;  %v1088_v8 = vmul.f32 %v2747_v44, %v3008_v46 }
 0x15f   : > { %2155 = vpow2.f32 %v1254_v49  ;;  %v889_v62 = vpop.permute.xlu1 %888  ;;  %v909_v48 = vpop.permute.xlu0 %908  ;;  %v3026_v9 = vmul.f32 %v2929_v21, %v1046_v39  ;;  %v1220_v26 = vmul.f32 -0.5, %v3017_v4  ;;  %v1129_v57 = vsub.f32 %v1091_v38, %v2771_v50 }
 0x160   : > { %1450 = vrot.lane.b32.xlu1 %v3010_v32, %s2235_s18  ;;  %v1093_v0 = vmul.f32 %v2747_v44, %v3014_v53  ;;  %v2070_v51 = vadd.f32 -1.0, %v2950_v19  ;;  %2157 = vpow2.f32 %v1264_v1  ;;  %v1126_v52 = vsub.f32 %v1088_v8, %v2771_v50 }
 0x161   : > { %v2148_v41 = vpop.eup %2147  ;;  %v2075_v35 = vadd.f32 -1.0, %v2958_v54  ;;  %v1258_v12 = vmul.f32 1.442695, %v1220_v26  ;;  %v3035_v55 = vmul.f32 %v1129_v57, %v1129_v57  ;;  %v1351_v49 = vmul.f32 %v2976_v33, %v1313_v60 }
 0x162   : > { %v2150_v5 = vpop.eup %2149  ;;  %v1311_v29 = vmul.f32 %v2148_v41, %v2069_v7  ;;  %v1131_v39 = vsub.f32 %v1093_v0, %v2771_v50  ;;  %v3042_v7 = vmul.f32 %v2929_v21, %v2961_v24  ;;  %v3044_v19 = vmul.f32 %v1126_v52, %v1126_v52 }
 0x163   : > { %v897_v31 = vpop.permute.xlu1 %896  ;;  %v917_v3 = vpop.permute.xlu0 %916  ;;  %v1315_v1 = vmul.f32 %v2150_v5, %v2073_v25  ;;  %2159 = vpow2.f32 %v1258_v12  ;;  %v1225_v54 = vmul.f32 -0.5, %v3035_v55  ;;  %v3049_v8 = vsel %vm1041_vm2, %v2863_v36, %v889_v62 }
 0x164   : > { %v1349_v43 = vmul.f32 %v2976_v33, %v1311_v29  ;;  %v2072_v26 = vadd.f32 -1.0, %v2981_v2  ;;  %v1222_v24 = vmul.f32 -0.5, %v3044_v19  ;;  %v2077_v57 = vadd.f32 -1.0, %v1159_v18 }
 0x165   : > { %v2152_v38 = vpop.eup %2151  ;;  %v3058_v0 = vmul.f32 %v2929_v21, %v2985_v27  ;;  %v1268_v25 = vmul.f32 1.442695, %v1225_v54  ;;  %v3060_v5 = vmul.f32 %v1131_v39, %v1131_v39  ;;  %v3066_v62 = vmul.f32 %v2929_v21, %v1053_v34 }
 0x166   : > { %v3052_v41 = vadd.f32 %v2979_v63, %v1349_v43  ;;  %v1312_v60 = vmul.f32 %v2152_v38, %v2070_v51  ;;  %v2154_v36 = vpop.eup %2153  ;;  %v1262_v2 = vmul.f32 1.442695, %v1222_v24  ;;  %v1090_v18 = vmul.f32 %v2747_v44, %v3049_v8 }
 0x167   : > { %v905_v29 = vpop.permute.xlu1 %904  ;;  %v3062_v52 = vpop.permute.xlu0 %924  ;;  %v3073_v51 = vadd.f32 %v2965_v59, %v1351_v49  ;;  %v1353_v12 = vmul.f32 %v2976_v33, %v1315_v1  ;;  %2161 = vpow2.f32 %v1268_v25  ;;  %v1227_v39 = vmul.f32 -0.5, %v3060_v5 }
 0x168   : > { %v1350_v63 = vmul.f32 %v2976_v33, %v1312_v60  ;;  %1452 = vrot.lane.b32.xlu0 %v3052_v41, %s2235_s18  ;;  %2163 = vpow2.f32 %v1262_v2  ;;  %v1128_v38 = vsub.f32 %v1090_v18, %v2771_v50  ;;  %v1317_v54 = vmul.f32 %v2154_v36, %v2075_v35 }
 0x169   : > { %v2156_v27 = vpop.eup %2155  ;;  %v1272_v60 = vmul.f32 1.442695, %v1227_v39  ;;  %v3083_v24 = vsel %vm1041_vm2, %v2900_v22, %v909_v48  ;;  %v3087_v59 = vsel %vm1041_vm2, %v2871_v37, %v897_v31  ;;  %v3096_v25 = vmul.f32 %v2929_v21, %v3008_v46 }
 0x16a   : > { %v3078_v43 = vadd.f32 %v2998_v13, %v1350_v63  ;;  %v1314_v34 = vmul.f32 %v2156_v27, %v2072_v26  ;;  %v2158_v13 = vpop.eup %2157  ;;  %v3098_v35 = vmul.f32 %v1128_v38, %v1128_v38  ;;  %v1095_v22 = vmul.f32 %v2747_v44, %v3083_v24 }
 0x16b   : > { %v3089_v49 = vpop.permute.xlu1 %912  ;;  %v3091_v1 = vpop.permute.xlu0 %932  ;;  %v3105_v37 = vadd.f32 %v2993_v15, %v1353_v12  ;;  %v2074_v48 = vadd.f32 -1.0, %v3017_v4  ;;  %2165 = vpow2.f32 %v1272_v60  ;;  %v1092_v31 = vmul.f32 %v2747_v44, %v3087_v59 }
 0x16c   : > { %v1352_v26 = vmul.f32 %v2976_v33, %v1314_v34  ;;  %1454 = vrot.lane.b32.xlu1 %v3078_v43, %s2235_s18  ;;  %1456 = vrot.lane.b32.xlu0 %v3073_v51, %s2235_s18  ;;  %v1319_v36 = vmul.f32 %v2158_v13, %v2077_v57  ;;  %v1224_v63 = vmul.f32 -0.5, %v3098_v35  ;;  %v1133_v2 = vsub.f32 %v1095_v22, %v2771_v50 }
 0x16d   : > { %3923 = vst [vmem:[#allocation2_spill] sm:$0xff] %v3105_v37  ;;  %v2160_v18 = vpop.eup %2159  ;;  %v1355_v15 = vmul.f32 %v2976_v33, %v1317_v54  ;;  %v1130_v4 = vsub.f32 %v1092_v31, %v2771_v50  ;;  %v3121_v27 = vsel %vm1041_vm2, %v2913_v45, %v917_v3  ;;  %v3125_v12 = vsel %vm1041_vm2, %v2886_v40, %v905_v29 }
 0x16e   : > { %v3113_v46 = vadd.f32 %v3026_v9, %v1352_v26  ;;  %v1316_v39 = vmul.f32 %v2160_v18, %v2074_v48  ;;  %v1266_v57 = vmul.f32 1.442695, %v1224_v63  ;;  %v3127_v34 = vmul.f32 %v1133_v2, %v1133_v2 }
 0x16f   : > { %v921_v9 = vpop.permute.xlu1 %920  ;;  %v1097_v38 = vmul.f32 %v2747_v44, %v3121_v27  ;;  %v3131_v60 = vpop.permute.xlu0 %940  ;;  %v2079_v45 = vadd.f32 -1.0, %v3035_v55  ;;  %v2076_v3 = vadd.f32 -1.0, %v3044_v19  ;;  %v3137_v54 = vmul.f32 %v1130_v4, %v1130_v4 }
 0x170   : > { %1458 = vrot.lane.b32.xlu1 %v3113_v46, %s2235_s18  ;;  %v1094_v40 = vmul.f32 %v2747_v44, %v3125_v12  ;;  %1460 = vrot.lane.b32.xlu0 %v3105_v37, %s2235_s18  ;;  %v1357_v29 = vmul.f32 %v2976_v33, %v1319_v36  ;;  %v1354_v13 = vmul.f32 %v2976_v33, %v1316_v39  ;;  %2167 = vpow2.f32 %v1266_v57 }
 0x171   : > { %v1229_v26 = vmul.f32 -0.5, %v3127_v34  ;;  %v2162_v22 = vpop.eup %2161  ;;  %v3147_v55 = vadd.f32 %v3002_v16, %v1355_v15  ;;  %v1226_v19 = vmul.f32 -0.5, %v3137_v54  ;;  %v1135_v48 = vsub.f32 %v1097_v38, %v2771_v50 }
 0x172   : > { %v1132_v31 = vsub.f32 %v1094_v40, %v2771_v50  ;;  %v2164_v2 = vpop.eup %2163  ;;  %v3155_v36 = vadd.f32 %v3058_v0, %v1354_v13  ;;  %v1321_v18 = vmul.f32 %v2162_v22, %v2079_v45  ;;  %v2081_v4 = vadd.f32 -1.0, %v3060_v5 }
 0x173   : > { %v3152_v63 = vpop.permute.xlu1 %928  ;;  %v1276_v39 = vmul.f32 1.442695, %v1229_v26  ;;  %v1318_v57 = vmul.f32 %v2164_v2, %v2076_v3  ;;  %v1270_v37 = vmul.f32 1.442695, %v1226_v19  ;;  %v3158_v16 = vmul.f32 %v1135_v48, %v1135_v48  ;;  %v3173_v5 = vpop.permute.xlu0 %944 }
 0x174   : > { %v3160_v15 = vmul.f32 %v1132_v31, %v1132_v31  ;;  %1464 = vrot.lane.b32.xlu0 %v3147_v55, %s2235_s18  ;;  %v3165_v38 = vadd.f32 %v3042_v7, %v1357_v29  ;;  %v1359_v40 = vmul.f32 %v2976_v33, %v1321_v18  ;;  %v3171_v0 = vsel %vm1041_vm2, %v2924_v47, %v3062_v52 }
 0x175   : > { %2169 = vpow2.f32 %v1276_v39  ;;  %1462 = vrot.lane.b32.xlu1 %v3155_v36, %s2235_s18  ;;  %v2166_v45 = vpop.eup %2165  ;;  %v1356_v3 = vmul.f32 %v2976_v33, %v1318_v57  ;;  %v1231_v7 = vmul.f32 -0.5, %v3158_v16  ;;  %v3182_v29 = vsel %vm1041_vm2, %v2894_v23, %v3089_v49 }
 0x176   : > { %2171 = vpow2.f32 %v1270_v37  ;;  %v1323_v47 = vmul.f32 %v2166_v45, %v2081_v4  ;;  %v1399_v52 = vmul.f32 %v2929_v21, %v3014_v53  ;;  %v1396_v26 = vmul.f32 %v2929_v21, %v3049_v8 }
 0x177   : > { %v3184_v13 = vpop.permute.xlu1 %936  ;;  %v1228_v22 = vmul.f32 -0.5, %v3160_v15  ;;  %v3192_v37 = vadd.f32 %v3096_v25, %v1356_v3  ;;  %v2078_v19 = vadd.f32 -1.0, %v3098_v35  ;;  %v1280_v48 = vmul.f32 1.442695, %v1231_v7  ;;  %v3222_v57 = vpop.permute.xlu0 %948 }
 0x178   : > { %v1099_v23 = vmul.f32 %v2747_v44, %v3171_v0  ;;  %1468 = vrot.lane.b32.xlu0 %v3165_v38, %s2235_s18  ;;  %v3200_v49 = vadd.f32 %v3066_v62, %v1359_v40  ;;  %v1361_v53 = vmul.f32 %v2976_v33, %v1323_v47  ;;  %v1096_v31 = vmul.f32 %v2747_v44, %v3182_v29 }
 0x179   : > { %v1274_v8 = vmul.f32 1.442695, %v1228_v22  ;;  %2173 = vpow2.f32 %v1280_v48  ;;  %v3209_v35 = vsel %vm1041_vm2, %v2943_v11, %v3091_v1  ;;  %v3213_v2 = vsel %vm1041_vm2, %v2906_v30, %v921_v9  ;;  %1466 = vrot.lane.b32.xlu1 %v3192_v37, %s2235_s18 }
 0x17a   : > { %v1137_v25 = vsub.f32 %v1099_v23, %v2771_v50  ;;  %v2168_v62 = vpop.eup %2167  ;;  %v1401_v18 = vmul.f32 %v2929_v21, %v3083_v24  ;;  %v1134_v4 = vsub.f32 %v1096_v31, %v2771_v50  ;;  %v1101_v39 = vmul.f32 %v2747_v44, %v3209_v35 }
 0x17b   : > { %2175 = vpow2.f32 %v1274_v8  ;;  %v1320_v1 = vmul.f32 %v2168_v62, %v2078_v19  ;;  %v1398_v30 = vmul.f32 %v2929_v21, %v3087_v59  ;;  %v1098_v40 = vmul.f32 %v2747_v44, %v3213_v2 }
 0x17c   : > { %v3224_v11 = vpop.permute.xlu1 %816  ;;  %v3228_v9 = vmul.f32 %v1137_v25, %v1137_v25  ;;  %1472 = vrot.lane.b32.xlu0 %v3200_v49, %s2235_s18  ;;  %v2083_v24 = vadd.f32 -1.0, %v3127_v34  ;;  %v3235_v45 = vmul.f32 %v1134_v4, %v1134_v4  ;;  %v1139_v3 = vsub.f32 %v1101_v39, %v2771_v50 }
 0x17d   : > { %v3241_v7 = vsel %vm1041_vm2, %v2956_v42, %v3131_v60  ;;  %v3243_v59 = vadd.f32 %v1399_v52, %v1361_v53  ;;  %v1358_v47 = vmul.f32 %v2976_v33, %v1320_v1  ;;  %v1136_v19 = vsub.f32 %v1098_v40, %v2771_v50  ;;  %v3263_v40 = vpop.permute.xlu0 %952 }
 0x17e   : > { %v1233_v22 = vmul.f32 -0.5, %v3228_v9  ;;  %v2080_v34 = vadd.f32 -1.0, %v3137_v54  ;;  %v1230_v23 = vmul.f32 -0.5, %v3235_v45  ;;  %v3250_v8 = vmul.f32 %v1139_v3, %v1139_v3 }
 0x17f   : > { %v2170_v48 = vpop.eup %2169  ;;  %v1103_v31 = vmul.f32 %v2747_v44, %v3241_v7  ;;  %v3254_v52 = vadd.f32 %v1396_v26, %v1358_v47  ;;  %v3256_v62 = vmul.f32 %v1136_v19, %v1136_v19  ;;  %v1403_v54 = vmul.f32 %v2929_v21, %v3121_v27 }
 0x180   : > { %v821_v42 = vpop.permute.xlu1 %820  ;;  %v2172_v60 = vpop.eup %2171  ;;  %v1325_v53 = vmul.f32 %v2170_v48, %v2083_v24  ;;  %v1284_v25 = vmul.f32 1.442695, %v1233_v22  ;;  %1476 = vrot.lane.b32.xlu0 %v3243_v59, %s2235_s18  ;;  %v1278_v39 = vmul.f32 1.442695, %v1230_v23  ;;  %v1235_v1 = vmul.f32 -0.5, %v3250_v8 }
 0x181   : > { %v1322_v4 = vmul.f32 %v2172_v60, %v2080_v34  ;;  %v2085_v26 = vadd.f32 -1.0, %v3158_v16  ;;  %v1232_v24 = vmul.f32 -0.5, %v3256_v62  ;;  %1470 = vrot.lane.b32.xlu1 %v3254_v52, %s2235_s18  ;;  %v1141_v27 = vsub.f32 %v1103_v31, %v2771_v50 }
 0x182   : > { %v1363_v3 = vmul.f32 %v2976_v33, %v1325_v53  ;;  %2177 = vpow2.f32 %v1284_v25  ;;  %v1288_v22 = vmul.f32 1.442695, %v1235_v1  ;;  %v2082_v23 = vadd.f32 -1.0, %v3160_v15 }
 0x183   : > { %v1360_v47 = vmul.f32 %v2976_v33, %v1322_v4  ;;  %2179 = vpow2.f32 %v1278_v39  ;;  %v2174_v48 = vpop.eup %2173  ;;  %v1282_v60 = vmul.f32 1.442695, %v1232_v24  ;;  %v3278_v16 = vsel %vm1041_vm2, %v2920_v28, %v3152_v63 }
 0x184   : > { %v825_v19 = vpop.permute.xlu1 %824  ;;  %v3272_v34 = vadd.f32 %v1401_v18, %v1363_v3  ;;  %v1327_v4 = vmul.f32 %v2174_v48, %v2085_v26  ;;  %2181 = vpow2.f32 %v1288_v22  ;;  %v3282_v39 = vmul.f32 %v1141_v27, %v1141_v27 }
 0x185   : > { %v2176_v53 = vpop.eup %2175  ;;  %v3280_v25 = vadd.f32 %v1398_v30, %v1360_v47  ;;  %v1400_v18 = vmul.f32 %v2929_v21, %v3125_v12  ;;  %2183 = vpow2.f32 %v1282_v60  ;;  %v1100_v15 = vmul.f32 %v2747_v44, %v3278_v16  ;;  %v3299_v12 = vpop.permute.xlu0 %956 }
 0x186   : > { %v1324_v31 = vmul.f32 %v2176_v53, %v2082_v23  ;;  %1480 = vrot.lane.b32.xlu0 %v3272_v34, %s2235_s18  ;;  %v1365_v28 = vmul.f32 %v2976_v33, %v1327_v4  ;;  %v1405_v63 = vmul.f32 %v2929_v21, %v3171_v0  ;;  %v1237_v30 = vmul.f32 -0.5, %v3282_v39 }
 0x187   : > { %v3297_v1 = vsel %vm1041_vm2, %v2936_v61, %v3184_v13  ;;  %1474 = vrot.lane.b32.xlu1 %v3280_v25, %s2235_s18  ;;  %v1402_v24 = vmul.f32 %v2929_v21, %v3182_v29  ;;  %v1138_v0 = vsub.f32 %v1100_v15, %v2771_v50  ;;  %v1033_v13 = vsel %vm1008_vm1, %v2800_v56, %v3224_v11 }
 0x188   : > { %v3303_v3 = vpop.permute.xlu1 %828  ;;  %v1362_v26 = vmul.f32 %v2976_v33, %v1324_v31  ;;  %v1102_v47 = vmul.f32 %v2747_v44, %v3297_v1  ;;  %v3311_v22 = vadd.f32 %v1403_v54, %v1365_v28  ;;  %v1292_v61 = vmul.f32 1.442695, %v1237_v30 }
 0x189   : > { %v1034_v27 = vsel %vm1008_vm1, %v2805_v6, %v821_v42  ;;  %v3320_v23 = vmul.f32 %v1138_v0, %v1138_v0  ;;  %v3325_v60 = vsel %vm1041_vm2, %v1033_v13, %v3173_v5  ;;  %v2087_v54 = vadd.f32 -1.0, %v3228_v9  ;;  %v961_v28 = vpop.permute.xlu0 %960 }
 0x18a   : > { %v3318_v48 = vadd.f32 %v1400_v18, %v1362_v26  ;;  %v1140_v29 = vsub.f32 %v1102_v47, %v2771_v50  ;;  %2185 = vpow2.f32 %v1292_v61  ;;  %v1104_v53 = vmul.f32 %v2747_v44, %v3325_v60  ;;  %1484 = vrot.lane.b32.xlu0 %v3311_v22, %s2235_s18 }
 0x18b   : > { %v3332_v56 = vsel %vm1041_vm2, %v1034_v27, %v3222_v57  ;;  %v2084_v42 = vadd.f32 -1.0, %v3235_v45  ;;  %v1234_v5 = vmul.f32 -0.5, %v3320_v23  ;;  %v2089_v18 = vadd.f32 -1.0, %v3250_v8 }
 0x18c   : > { %v833_v6 = vpop.permute.xlu1 %832  ;;  %v2178_v11 = vpop.eup %2177  ;;  %v3338_v4 = vmul.f32 %v1140_v29, %v1140_v29  ;;  %v1105_v9 = vmul.f32 %v2747_v44, %v3332_v56  ;;  %1478 = vrot.lane.b32.xlu1 %v3318_v48, %s2235_s18  ;;  %v1142_v15 = vsub.f32 %v1104_v53, %v2771_v50  ;;  %v1035_v45 = vsel %vm1008_vm1, %v2812_v58, %v825_v19 }
 0x18d   : > { %v2180_v31 = vpop.eup %2179  ;;  %v1329_v57 = vmul.f32 %v2178_v11, %v2087_v54  ;;  %v2086_v26 = vadd.f32 -1.0, %v3256_v62  ;;  %v1286_v0 = vmul.f32 1.442695, %v1234_v5  ;;  %v3356_v8 = vsel %vm1041_vm2, %v1035_v45, %v3263_v40 }
 0x18e   : > { %v1326_v30 = vmul.f32 %v2180_v31, %v2084_v42  ;;  %v1236_v47 = vmul.f32 -0.5, %v3338_v4  ;;  %v2182_v61 = vpop.eup %2181  ;;  %v3351_v27 = vmul.f32 %v1142_v15, %v1142_v15  ;;  %v1143_v29 = vsub.f32 %v1105_v9, %v2771_v50 }
 0x18f   : > { %v1367_v13 = vmul.f32 %v2976_v33, %v1329_v57  ;;  %v2184_v53 = vpop.eup %2183  ;;  %v1331_v19 = vmul.f32 %v2182_v61, %v2089_v18  ;;  %2187 = vpow2.f32 %v1286_v0  ;;  %v1407_v42 = vmul.f32 %v2929_v21, %v3209_v35  ;;  %v965_v35 = vpop.permute.xlu0 %964 }
 0x190   : > { %v837_v54 = vpop.permute.xlu1 %836  ;;  %v1364_v58 = vmul.f32 %v2976_v33, %v1326_v30  ;;  %v1290_v62 = vmul.f32 1.442695, %v1236_v47  ;;  %v1328_v5 = vmul.f32 %v2184_v53, %v2086_v26  ;;  %v1238_v31 = vmul.f32 -0.5, %v3351_v27 }
 0x191   : > { %v3359_v11 = vadd.f32 %v1405_v63, %v1367_v13  ;;  %v1369_v40 = vmul.f32 %v2976_v33, %v1331_v19  ;;  %v3367_v57 = vmul.f32 %v1143_v29, %v1143_v29  ;;  %v1404_v18 = vmul.f32 %v2929_v21, %v3213_v2 }
 0x192   : > { %v3364_v9 = vadd.f32 %v1402_v24, %v1364_v58  ;;  %2189 = vpow2.f32 %v1290_v62  ;;  %v1366_v15 = vmul.f32 %v2976_v33, %v1328_v5  ;;  %v1294_v63 = vmul.f32 1.442695, %v1238_v31 }
 0x193   : > { %v1106_v45 = vmul.f32 %v2747_v44, %v3356_v8  ;;  %1488 = vrot.lane.b32.xlu0 %v3359_v11, %s2235_s18  ;;  %v3376_v24 = vadd.f32 %v1407_v42, %v1369_v40  ;;  %v2091_v30 = vadd.f32 -1.0, %v3282_v39  ;;  %v1239_v26 = vmul.f32 -0.5, %v3367_v57 }
 0x194   : > { %v1036_v0 = vsel %vm1008_vm1, %v2817_v10, %v3303_v3  ;;  %1482 = vrot.lane.b32.xlu1 %v3364_v9, %s2235_s18  ;;  %v841_v2 = vpop.permute.xlu1 %840  ;;  %v2186_v47 = vpop.eup %2185  ;;  %v3385_v61 = vadd.f32 %v1404_v18, %v1366_v15  ;;  %2191 = vpow2.f32 %v1294_v63  ;;  %v1409_v53 = vmul.f32 %v2929_v21, %v3241_v7 }
 0x195   : > { %v1144_v13 = vsub.f32 %v1106_v45, %v2771_v50  ;;  %v3390_v29 = vsel %vm1041_vm2, %v1036_v0, %v3299_v12  ;;  %v1333_v39 = vmul.f32 %v2186_v47, %v2091_v30  ;;  %v1296_v58 = vmul.f32 1.442695, %v1239_v26  ;;  %v3924_v26 = vld [vmem:[#allocation14_spill] sm:$0xff]  ;;  %v3925_v0 = vld [vmem:[#allocation7_spill] sm:$0xff] }
 0x196   : > { %v1107_v10 = vmul.f32 %v2747_v44, %v3390_v29  ;;  %v1037_v19 = vsel %vm1008_vm1, %v2824_v14, %v833_v6  ;;  %v1038_v62 = vsel %vm1008_vm1, %v2829_v17, %v837_v54  ;;  %v1039_v12 = vsel %vm1008_vm1, %v2834_v20, %v841_v2  ;;  %v969_v54 = vpop.permute.xlu0 %968 }
 0x197   : > { %v3396_v3 = vmul.f32 %v1144_v13, %v1144_v13  ;;  %1492 = vrot.lane.b32.xlu0 %v3376_v24, %s2235_s18  ;;  %v1371_v7 = vmul.f32 %v2976_v33, %v1333_v39  ;;  %2193 = vpow2.f32 %v1296_v58  ;;  %v3409_v5 = vsel %vm1041_vm2, %v1037_v19, %v961_v28 }
 0x198   : > { %v1145_v42 = vsub.f32 %v1107_v10, %v2771_v50  ;;  %1486 = vrot.lane.b32.xlu1 %v3385_v61, %s2235_s18  ;;  %v2088_v14 = vadd.f32 -1.0, %v3320_v23  ;;  %v2090_v17 = vadd.f32 -1.0, %v3338_v4  ;;  %v1108_v20 = vmul.f32 %v2747_v44, %v3409_v5 }
 0x199   : > { %v1240_v6 = vmul.f32 -0.5, %v3396_v3  ;;  %v2188_v31 = vpop.eup %2187  ;;  %v3418_v40 = vadd.f32 %v1409_v53, %v1371_v7  ;;  %v3421_v28 = vsel %vm1041_vm2, %v1038_v62, %v965_v35  ;;  %v3424_v18 = vsel %vm1041_vm2, %v1039_v12, %v969_v54 }
 0x19a   : > { %v1177_v15 = vmul.f32 %v1145_v42, %v1145_v42  ;;  %v1330_v63 = vmul.f32 %v2188_v31, %v2088_v14  ;;  %v1146_v4 = vsub.f32 %v1108_v20, %v2771_v50  ;;  %v1109_v45 = vmul.f32 %v2747_v44, %v3421_v28 }
 0x19b   : > { %v1298_v23 = vmul.f32 1.442695, %v1240_v6  ;;  %v1007_v2 = vsel %vm975_vm0, %v3925_v0, %v3924_v26  ;;  %v1406_v47 = vmul.f32 %v2929_v21, %v3278_v16  ;;  %v1110_v13 = vmul.f32 %v2747_v44, %v3424_v18  ;;  %1496 = vrot.lane.b32.xlu0 %v3418_v40, %s2235_s18  ;;  %v845_v16 = vpop.permute.xlu1 %844  ;;  %v973_v26 = vpop.permute.xlu0 %972 }
 0x19c   : > { %v2190_v30 = vpop.eup %2189  ;;  %v1241_v35 = vmul.f32 -0.5, %v1177_v15  ;;  %v1368_v39 = vmul.f32 %v2976_v33, %v1330_v63  ;;  %v1178_v58 = vmul.f32 %v1146_v4, %v1146_v4  ;;  %v2092_v10 = vadd.f32 -1.0, %v3351_v27 }
 0x19d   : > { %v1332_v53 = vmul.f32 %v2190_v30, %v2090_v17  ;;  %2195 = vpow2.f32 %v1298_v23  ;;  %v1147_v62 = vsub.f32 %v1109_v45, %v2771_v50  ;;  %v1148_v12 = vsub.f32 %v1110_v13, %v2771_v50 }
 0x19e   : > { %v1300_v19 = vmul.f32 1.442695, %v1241_v35  ;;  %v2192_v7 = vpop.eup %2191  ;;  %v3442_v42 = vadd.f32 %v1406_v47, %v1368_v39  ;;  %v1408_v6 = vmul.f32 %v2929_v21, %v3297_v1  ;;  %v1242_v54 = vmul.f32 -0.5, %v1178_v58 }
 0x19f   : > { %v1370_v14 = vmul.f32 %v2976_v33, %v1332_v53  ;;  %v1334_v17 = vmul.f32 %v2192_v7, %v2092_v10  ;;  %v1179_v20 = vmul.f32 %v1147_v62, %v1147_v62  ;;  %v1180_v31 = vmul.f32 %v1148_v12, %v1148_v12 }
 0x1a0   : > { %2197 = vpow2.f32 %v1300_v19  ;;  %v2093_v63 = vadd.f32 -1.0, %v3367_v57  ;;  %v1302_v23 = vmul.f32 1.442695, %v1242_v54  ;;  %1490 = vrot.lane.b32.xlu1 %v3442_v42, %s2235_s18  ;;  %v1040_v4 = vsel %vm1008_vm1, %v1007_v2, %v845_v16 }
 0x1a1   : > { %v3447_v27 = vadd.f32 %v1408_v6, %v1370_v14  ;;  %v2194_v45 = vpop.eup %2193  ;;  %v1372_v30 = vmul.f32 %v2976_v33, %v1334_v17  ;;  %v1410_v1 = vmul.f32 %v2929_v21, %v3325_v60  ;;  %v1243_v0 = vmul.f32 -0.5, %v1179_v20 }
 0x1a2   : > { %v1335_v47 = vmul.f32 %v2194_v45, %v2093_v63  ;;  %2199 = vpow2.f32 %v1302_v23  ;;  %v1244_v35 = vmul.f32 -0.5, %v1180_v31  ;;  %v1073_v13 = vsel %vm1041_vm2, %v1040_v4, %v973_v26 }
 0x1a3   : > { %v1304_v57 = vmul.f32 1.442695, %v1243_v0  ;;  %v1111_v39 = vmul.f32 %v2747_v44, %v1073_v13  ;;  %v3458_v53 = vadd.f32 %v1410_v1, %v1372_v30  ;;  %v1411_v10 = vmul.f32 %v2929_v21, %v3332_v56 }
 0x1a4   : > { %v1373_v2 = vmul.f32 %v2976_v33, %v1335_v47  ;;  %v1306_v19 = vmul.f32 1.442695, %v1244_v35  ;;  %1494 = vrot.lane.b32.xlu1 %v3447_v27, %s2235_s18  ;;  %v2094_v60 = vadd.f32 -1.0, %v3396_v3  ;;  %v2095_v14 = vadd.f32 -1.0, %v1177_v15 }
 0x1a5   : > { %2201 = vpow2.f32 %v1304_v57  ;;  %v1149_v62 = vsub.f32 %v1111_v39, %v2771_v50  ;;  %v1412_v3 = vmul.f32 %v2929_v21, %v3356_v8  ;;  %v2096_v63 = vadd.f32 -1.0, %v1178_v58 }
 0x1a6   : > { %v3467_v16 = vadd.f32 %v1411_v10, %v1373_v2  ;;  %2203 = vpow2.f32 %v1306_v19  ;;  %v1413_v45 = vmul.f32 %v2929_v21, %v3390_v29  ;;  %v2097_v8 = vadd.f32 -1.0, %v1179_v20 }
 0x1a7   : > { %v2196_v12 = vpop.eup %2195  ;;  %v1181_v7 = vmul.f32 %v1149_v62, %v1149_v62  ;;  %v1414_v58 = vmul.f32 %v2929_v21, %v3409_v5  ;;  %v2098_v47 = vadd.f32 -1.0, %v1180_v31  ;;  %v1415_v20 = vmul.f32 %v2929_v21, %v3421_v28 }
 0x1a8   : > { %v1336_v44 = vmul.f32 %v2196_v12, %v2094_v60  ;;  %1498 = vrot.lane.b32.xlu1 %v3458_v53, %s2235_s18  ;;  %1500 = vrot.lane.b32.xlu0 %v3467_v16, %s2235_s18  ;;  %v1416_v19 = vmul.f32 %v2929_v21, %v3424_v18  ;;  %v1417_v18 = vmul.f32 %v2929_v21, %v1073_v13 }
 0x1a9   : > { %v1245_v50 = vmul.f32 -0.5, %v1181_v7  ;;  %v2099_v60 = vadd.f32 -1.0, %v1181_v7 }
 0x1aa   : > { %v2198_v56 = vpop.eup %2197  ;;  %v1374_v6 = vmul.f32 %v2976_v33, %v1336_v44 }
 0x1ab   : > { %v1337_v54 = vmul.f32 %v2198_v56, %v2095_v14  ;;  %v1308_v23 = vmul.f32 1.442695, %v1245_v50 }
 0x1ac   : > { %v3476_v17 = vadd.f32 %v1412_v3, %v1374_v6  ;;  %v2200_v4 = vpop.eup %2199 }
 0x1ad   : > { %v1375_v15 = vmul.f32 %v2976_v33, %v1337_v54  ;;  %v1338_v30 = vmul.f32 %v2200_v4, %v2096_v63  ;;  %2205 = vpow2.f32 %v1308_v23  ;;  %v3926_v54 = vld [vmem:[#allocation2_spill] sm:$0xff] }
 0x1ae   : > { %1502 = vrot.lane.b32.xlu1 %v3476_v17, %s2235_s18 }
 0x1af   : > { %v3483_v1 = vadd.f32 %v1413_v45, %v1375_v15  ;;  %v2202_v26 = vpop.eup %2201  ;;  %v1376_v0 = vmul.f32 %v2976_v33, %v1338_v30 }
 0x1b0   : > { %v2204_v35 = vpop.eup %2203  ;;  %v1339_v57 = vmul.f32 %v2202_v26, %v2097_v8 }
 0x1b1   : > { %1504 = vrot.lane.b32.xlu0 %v3483_v1, %s2235_s18  ;;  %v3490_v29 = vadd.f32 %v1414_v58, %v1376_v0  ;;  %v1340_v39 = vmul.f32 %v2204_v35, %v2098_v47 }
 0x1b2   : > { %v1377_v2 = vmul.f32 %v2976_v33, %v1339_v57 }
 0x1b3   : > { %v1378_v10 = vmul.f32 %v2976_v33, %v1340_v39  ;;  %1506 = vrot.lane.b32.xlu1 %v3490_v29, %s2235_s18 }
 0x1b4   : > { %v3500_v5 = vadd.f32 %v1415_v20, %v1377_v2 }
 0x1b5   : > { %v3502_v31 = vadd.f32 %v1416_v19, %v1378_v10 }
 0x1b6   : > { %1508 = vrot.lane.b32.xlu0 %v3500_v5, %s2235_s18 }
 0x1b7   : > { %v2206_v62 = vpop.eup %2205  ;;  %1510 = vrot.lane.b32.xlu1 %v3502_v31, %s2235_s18 }
 0x1b8   : > { %v1341_v28 = vmul.f32 %v2206_v62, %v2099_v60 }
 0x1ba   : > { %v1379_v12 = vmul.f32 %v2976_v33, %v1341_v28 }
 0x1bc   : > { %v3510_v44 = vadd.f32 %v1417_v18, %v1379_v12 }
 0x1be   : > { %1512 = vrot.lane.b32.xlu0 %v3510_v44, %s2235_s18 }
 0x1d2   : > { %v1451_v14 = vpop.permute.xlu1 %1450 }
 0x1d3   : > { %v3515_v7 = vadd.f32 %v1451_v14, %v3010_v32 }
 0x1d5   : > { %1546 = vrot.lane.b32.xlu1 %v3515_v7, %s2236_s19 }
 0x1da   : > { %v1453_v56 = vpop.permute.xlu0 %1452 }
 0x1db   : > { %v3520_v6 = vadd.f32 %v1453_v56, %v3052_v41 }
 0x1dd   : > { %1548 = vrot.lane.b32.xlu0 %v3520_v6, %s2236_s19 }
 0x1de   : > { %v1455_v21 = vpop.permute.xlu1 %1454  ;;  %v1457_v13 = vpop.permute.xlu0 %1456 }
 0x1df   : > { %v3525_v33 = vadd.f32 %v1455_v21, %v3078_v43  ;;  %v3528_v3 = vadd.f32 %v1457_v13, %v3073_v51 }
 0x1e1   : > { %1550 = vrot.lane.b32.xlu1 %v3525_v33, %s2236_s19  ;;  %1552 = vrot.lane.b32.xlu0 %v3528_v3, %s2236_s19 }
 0x1e2   : > { %v1459_v32 = vpop.permute.xlu1 %1458  ;;  %v1461_v50 = vpop.permute.xlu0 %1460 }
 0x1e3   : > { %v3535_v41 = vadd.f32 %v1459_v32, %v3113_v46  ;;  %v3538_v63 = vadd.f32 %v1461_v50, %v3926_v54 }
 0x1e5   : > { %1554 = vrot.lane.b32.xlu1 %v3535_v41, %s2236_s19  ;;  %1556 = vrot.lane.b32.xlu0 %v3538_v63, %s2236_s19 }
 0x1e6   : > { %v1465_v51 = vpop.permute.xlu0 %1464 }
 0x1e7   : > { %v1463_v43 = vpop.permute.xlu1 %1462  ;;  %v3545_v23 = vadd.f32 %v1465_v51, %v3147_v55 }
 0x1e8   : > { %v3548_v4 = vadd.f32 %v1463_v43, %v3155_v36 }
 0x1e9   : > { %1560 = vrot.lane.b32.xlu0 %v3545_v23, %s2236_s19 }
 0x1ea   : > { %1558 = vrot.lane.b32.xlu1 %v3548_v4, %s2236_s19  ;;  %v1469_v46 = vpop.permute.xlu0 %1468 }
 0x1eb   : > { %v3555_v15 = vadd.f32 %v1469_v46, %v3165_v38  ;;  %v1467_v45 = vpop.permute.xlu1 %1466 }
 0x1ec   : > { %v3558_v30 = vadd.f32 %v1467_v45, %v3192_v37 }
 0x1ed   : > { %1564 = vrot.lane.b32.xlu0 %v3555_v15, %s2236_s19 }
 0x1ee   : > { %v1473_v55 = vpop.permute.xlu0 %1472  ;;  %1562 = vrot.lane.b32.xlu1 %v3558_v30, %s2236_s19 }
 0x1ef   : > { %v3565_v36 = vadd.f32 %v1473_v55, %v3200_v49 }
 0x1f1   : > { %1568 = vrot.lane.b32.xlu0 %v3565_v36, %s2236_s19 }
 0x1f2   : > { %v1477_v8 = vpop.permute.xlu0 %1476 }
 0x1f3   : > { %v3570_v38 = vadd.f32 %v1477_v8, %v3243_v59  ;;  %v1471_v26 = vpop.permute.xlu1 %1470 }
 0x1f4   : > { %v3573_v37 = vadd.f32 %v1471_v26, %v3254_v52 }
 0x1f5   : > { %1572 = vrot.lane.b32.xlu0 %v3570_v38, %s2236_s19 }
 0x1f6   : > { %1566 = vrot.lane.b32.xlu1 %v3573_v37, %s2236_s19 }
 0x1f8   : > { %v1481_v0 = vpop.permute.xlu0 %1480 }
 0x1f9   : > { %v1475_v49 = vpop.permute.xlu1 %1474  ;;  %v3580_v58 = vadd.f32 %v1481_v0, %v3272_v34 }
 0x1fa   : > { %v3583_v47 = vadd.f32 %v1475_v49, %v3280_v25 }
 0x1fb   : > { %1576 = vrot.lane.b32.xlu0 %v3580_v58, %s2236_s19 }
 0x1fc   : > { %1570 = vrot.lane.b32.xlu1 %v3583_v47, %s2236_s19  ;;  %v1485_v59 = vpop.permute.xlu0 %1484 }
 0x1fd   : > { %v3590_v35 = vadd.f32 %v1485_v59, %v3311_v22 }
 0x1fe   : > { %v1479_v52 = vpop.permute.xlu1 %1478 }
 0x1ff   : > { %v3593_v57 = vadd.f32 %v1479_v52, %v3318_v48  ;;  %1580 = vrot.lane.b32.xlu0 %v3590_v35, %s2236_s19 }
 0x201   : > { %1574 = vrot.lane.b32.xlu1 %v3593_v57, %s2236_s19 }
 0x205   : > { %v1489_v34 = vpop.permute.xlu0 %1488 }
 0x206   : > { %v1483_v25 = vpop.permute.xlu1 %1482  ;;  %v3600_v39 = vadd.f32 %v1489_v34, %v3359_v11 }
 0x207   : > { %v3603_v2 = vadd.f32 %v1483_v25, %v3364_v9 }
 0x208   : > { %1584 = vrot.lane.b32.xlu0 %v3600_v39, %s2236_s19 }
 0x209   : > { %1578 = vrot.lane.b32.xlu1 %v3603_v2, %s2236_s19  ;;  %v1493_v22 = vpop.permute.xlu0 %1492 }
 0x20a   : > { %v1487_v48 = vpop.permute.xlu1 %1486  ;;  %v3610_v20 = vadd.f32 %v1493_v22, %v3376_v24 }
 0x20b   : > { %v3613_v10 = vadd.f32 %v1487_v48, %v3385_v61 }
 0x20c   : > { %1588 = vrot.lane.b32.xlu0 %v3610_v20, %s2236_s19 }
 0x20d   : > { %1582 = vrot.lane.b32.xlu1 %v3613_v10, %s2236_s19  ;;  %v1497_v11 = vpop.permute.xlu0 %1496 }
 0x20e   : > { %v3620_v9 = vadd.f32 %v1497_v11, %v3418_v40 }
 0x210   : > { %1592 = vrot.lane.b32.xlu0 %v3620_v9, %s2236_s19 }
 0x212   : > { %v1491_v19 = vpop.permute.xlu1 %1490 }
 0x213   : > { %v3625_v24 = vadd.f32 %v1491_v19, %v3442_v42 }
 0x215   : > { %1586 = vrot.lane.b32.xlu1 %v3625_v24, %s2236_s19 }
 0x216   : > { %v1495_v61 = vpop.permute.xlu1 %1494 }
 0x217   : > { %v3630_v60 = vadd.f32 %v1495_v61, %v3447_v27 }
 0x219   : > { %1590 = vrot.lane.b32.xlu1 %v3630_v60, %s2236_s19 }
 0x21a   : > { %v1499_v62 = vpop.permute.xlu1 %1498  ;;  %v1501_v40 = vpop.permute.xlu0 %1500 }
 0x21b   : > { %v3635_v28 = vadd.f32 %v1499_v62, %v3458_v53  ;;  %v3638_v12 = vadd.f32 %v1501_v40, %v3467_v16 }
 0x21d   : > { %1594 = vrot.lane.b32.xlu1 %v3635_v28, %s2236_s19  ;;  %1596 = vrot.lane.b32.xlu0 %v3638_v12, %s2236_s19 }
 0x220   : > { %v1503_v42 = vpop.permute.xlu1 %1502 }
 0x221   : > { %v3645_v27 = vadd.f32 %v1503_v42, %v3476_v17 }
 0x223   : > { %1598 = vrot.lane.b32.xlu1 %v3645_v27, %s2236_s19  ;;  %v1505_v18 = vpop.permute.xlu0 %1504 }
 0x224   : > { %v3650_v53 = vadd.f32 %v1505_v18, %v3483_v1 }
 0x225   : > { %v1507_v16 = vpop.permute.xlu1 %1506 }
 0x226   : > { %1600 = vrot.lane.b32.xlu0 %v3650_v53, %s2236_s19  ;;  %v3655_v14 = vadd.f32 %v1507_v16, %v3490_v29 }
 0x228   : > { %1602 = vrot.lane.b32.xlu1 %v3655_v14, %s2236_s19  ;;  %v1509_v17 = vpop.permute.xlu0 %1508 }
 0x229   : > { %v3660_v56 = vadd.f32 %v1509_v17, %v3500_v5  ;;  %v1511_v21 = vpop.permute.xlu1 %1510 }
 0x22a   : > { %v3663_v13 = vadd.f32 %v1511_v21, %v3502_v31 }
 0x22b   : > { %1604 = vrot.lane.b32.xlu0 %v3660_v56, %s2236_s19 }
 0x22c   : > { %1606 = vrot.lane.b32.xlu1 %v3663_v13, %s2236_s19 }
 0x230   : > { %v1513_v1 = vpop.permute.xlu0 %1512 }
 0x231   : > { %v3670_v29 = vadd.f32 %v1513_v1, %v3510_v44 }
 0x233   : > { %1608 = vrot.lane.b32.xlu0 %v3670_v29, %s2236_s19 }
 0x247   : > { %v1547_v5 = vpop.permute.xlu1 %1546 }
 0x248   : > { %v1610_v31 = vadd.f32 %v1547_v5, %v3515_v7 }
 0x24a   : > { %1642 = vst.msk [vmem:[%s3679_s22] sm:$0xff] %vm975_vm0, %v1610_v31  ;;  %v1743_v50 = vmul.f32 %v1610_v31, %v1610_v31  ;;  %v1674_v46 = vsel %vm975_vm0, %v1610_v31, 0.0 }
 0x24f   : > { %v1549_v32 = vpop.permute.xlu0 %1548 }
 0x250   : > { %v1611_v44 = vadd.f32 %v1549_v32, %v3520_v6  ;;  %v1775_v6 = vsel %vm975_vm0, %v1743_v50, 0.0 }
 0x252   : > { %1643 = vst.msk [vmem:[%s3679_s22 + $0x8] sm:$0xff] %vm975_vm0, %v1611_v44  ;;  %v1675_v54 = vsel %vm975_vm0, %v1611_v44, 0.0  ;;  %v1744_v51 = vmul.f32 %v1611_v44, %v1611_v44 }
 0x253   : > { %v1551_v43 = vpop.permute.xlu1 %1550  ;;  %v1553_v55 = vpop.permute.xlu0 %1552  ;;  %v1676_v8 = vadd.f32 %v1675_v54, %v1674_v46 }
 0x254   : > { %v1776_v45 = vsel %vm975_vm0, %v1744_v51, 0.0  ;;  %v1612_v7 = vadd.f32 %v1551_v43, %v3525_v33  ;;  %v1613_v26 = vadd.f32 %v1553_v55, %v3528_v3 }
 0x255   : > { %v1777_v59 = vadd.f32 %v1776_v45, %v1775_v6 }
 0x256   : > { %1644 = vst.msk [vmem:[%s3679_s22 + $0x10] sm:$0xff] %vm975_vm0, %v1612_v7  ;;  %v1677_v0 = vsel %vm975_vm0, %v1612_v7, 0.0  ;;  %v1745_v49 = vmul.f32 %v1612_v7, %v1612_v7  ;;  %1645 = vst.msk [vmem:[%s3679_s22 + $0x18] sm:$0xff] %vm975_vm0, %v1613_v26  ;;  %v1746_v34 = vmul.f32 %v1613_v26, %v1613_v26  ;;  %v1679_v22 = vsel %vm975_vm0, %v1613_v26, 0.0 }
 0x257   : > { %v1678_v52 = vadd.f32 %v1677_v0, %v1676_v8  ;;  %v1555_v25 = vpop.permute.xlu1 %1554  ;;  %v1557_v48 = vpop.permute.xlu0 %1556 }
 0x258   : > { %v1778_v33 = vsel %vm975_vm0, %v1745_v49, 0.0  ;;  %v1614_v3 = vadd.f32 %v1555_v25, %v3535_v41  ;;  %v1615_v61 = vadd.f32 %v1557_v48, %v3538_v63  ;;  %v1780_v62 = vsel %vm975_vm0, %v1746_v34, 0.0 }
 0x259   : > { %v1779_v11 = vadd.f32 %v1778_v33, %v1777_v59  ;;  %v1680_v19 = vadd.f32 %v1679_v22, %v1678_v52 }
 0x25a   : > { %1646 = vst.msk [vmem:[%s3679_s22 + $0x20] sm:$0xff] %vm975_vm0, %v1614_v3  ;;  %v1681_v40 = vsel %vm975_vm0, %v1614_v3, 0.0  ;;  %v1747_v42 = vmul.f32 %v1614_v3, %v1614_v3  ;;  %1647 = vst.msk [vmem:[%s3679_s22 + $0x28] sm:$0xff] %vm975_vm0, %v1615_v61  ;;  %v1748_v17 = vmul.f32 %v1615_v61, %v1615_v61  ;;  %v1683_v21 = vsel %vm975_vm0, %v1615_v61, 0.0 }
 0x25b   : > { %v1781_v18 = vadd.f32 %v1780_v62, %v1779_v11  ;;  %v1682_v16 = vadd.f32 %v1681_v40, %v1680_v19  ;;  %v1561_v1 = vpop.permute.xlu0 %1560 }
 0x25c   : > { %v1782_v41 = vsel %vm975_vm0, %v1747_v42, 0.0  ;;  %v1559_v31 = vpop.permute.xlu1 %1558  ;;  %v1617_v32 = vadd.f32 %v1561_v1, %v3545_v23  ;;  %v1784_v44 = vsel %vm975_vm0, %v1748_v17, 0.0 }
 0x25d   : > { %v1783_v63 = vadd.f32 %v1782_v41, %v1781_v18  ;;  %v1684_v5 = vadd.f32 %v1683_v21, %v1682_v16  ;;  %v1616_v50 = vadd.f32 %v1559_v31, %v3548_v4 }
 0x25e   : > { %1649 = vst.msk [vmem:[%s3679_s22 + $0x38] sm:$0xff] %vm975_vm0, %v1617_v32  ;;  %v1750_v46 = vmul.f32 %v1617_v32, %v1617_v32  ;;  %v1687_v8 = vsel %vm975_vm0, %v1617_v32, 0.0 }
 0x25f   : > { %v1785_v54 = vadd.f32 %v1784_v44, %v1783_v63  ;;  %1648 = vst.msk [vmem:[%s3679_s22 + $0x30] sm:$0xff] %vm975_vm0, %v1616_v50  ;;  %v1685_v51 = vsel %vm975_vm0, %v1616_v50, 0.0  ;;  %v1749_v43 = vmul.f32 %v1616_v50, %v1616_v50  ;;  %v1565_v45 = vpop.permute.xlu0 %1564 }
 0x260   : > { %v1686_v7 = vadd.f32 %v1685_v51, %v1684_v5  ;;  %v1619_v55 = vadd.f32 %v1565_v45, %v3555_v15  ;;  %v1563_v4 = vpop.permute.xlu1 %1562  ;;  %v1788_v49 = vsel %vm975_vm0, %v1750_v46, 0.0 }
 0x261   : > { %v1786_v23 = vsel %vm975_vm0, %v1749_v43, 0.0  ;;  %v1618_v0 = vadd.f32 %v1563_v4, %v3558_v30 }
 0x262   : > { %v1787_v26 = vadd.f32 %v1786_v23, %v1785_v54  ;;  %v1688_v6 = vadd.f32 %v1687_v8, %v1686_v7  ;;  %1651 = vst.msk [vmem:[%s3679_s22 + $0x48] sm:$0xff] %vm975_vm0, %v1619_v55  ;;  %v1752_v3 = vmul.f32 %v1619_v55, %v1619_v55  ;;  %v1691_v11 = vsel %vm975_vm0, %v1619_v55, 0.0 }
 0x263   : > { %v1569_v59 = vpop.permute.xlu0 %1568  ;;  %1650 = vst.msk [vmem:[%s3679_s22 + $0x40] sm:$0xff] %vm975_vm0, %v1618_v0  ;;  %v1689_v15 = vsel %vm975_vm0, %v1618_v0, 0.0  ;;  %v1751_v34 = vmul.f32 %v1618_v0, %v1618_v0 }
 0x264   : > { %v1789_v52 = vadd.f32 %v1788_v49, %v1787_v26  ;;  %v1621_v25 = vadd.f32 %v1569_v59, %v3565_v36  ;;  %v1690_v33 = vadd.f32 %v1689_v15, %v1688_v6  ;;  %v1792_v40 = vsel %vm975_vm0, %v1752_v3, 0.0 }
 0x265   : > { %v1790_v22 = vsel %vm975_vm0, %v1751_v34, 0.0 }
 0x266   : > { %1653 = vst.msk [vmem:[%s3679_s22 + $0x58] sm:$0xff] %vm975_vm0, %v1621_v25  ;;  %v1791_v30 = vadd.f32 %v1790_v22, %v1789_v52  ;;  %v1692_v61 = vadd.f32 %v1691_v11, %v1690_v33  ;;  %v1754_v17 = vmul.f32 %v1621_v25, %v1621_v25  ;;  %v1695_v1 = vsel %vm975_vm0, %v1621_v25, 0.0 }
 0x267   : > { %v1573_v48 = vpop.permute.xlu0 %1572 }
 0x268   : > { %v1623_v19 = vadd.f32 %v1573_v48, %v3570_v38  ;;  %v1567_v62 = vpop.permute.xlu1 %1566  ;;  %v1793_v36 = vadd.f32 %v1792_v40, %v1791_v30  ;;  %v1796_v44 = vsel %vm975_vm0, %v1754_v17, 0.0 }
 0x269   : > { %v1620_v42 = vadd.f32 %v1567_v62, %v3573_v37 }
 0x26a   : > { %1655 = vst.msk [vmem:[%s3679_s22 + $0x68] sm:$0xff] %vm975_vm0, %v1623_v19  ;;  %v1756_v43 = vmul.f32 %v1623_v19, %v1623_v19  ;;  %v1699_v7 = vsel %vm975_vm0, %v1623_v19, 0.0 }
 0x26b   : > { %1652 = vst.msk [vmem:[%s3679_s22 + $0x50] sm:$0xff] %vm975_vm0, %v1620_v42  ;;  %v1693_v18 = vsel %vm975_vm0, %v1620_v42, 0.0  ;;  %v1753_v16 = vmul.f32 %v1620_v42, %v1620_v42 }
 0x26c   : > { %v1694_v41 = vadd.f32 %v1693_v18, %v1692_v61  ;;  %v1800_v26 = vsel %vm975_vm0, %v1756_v43, 0.0 }
 0x26d   : > { %v1577_v21 = vpop.permute.xlu0 %1576  ;;  %v1794_v38 = vsel %vm975_vm0, %v1753_v16, 0.0 }
 0x26e   : > { %v1571_v63 = vpop.permute.xlu1 %1570  ;;  %v1625_v37 = vadd.f32 %v1577_v21, %v3580_v58  ;;  %v1795_v5 = vadd.f32 %v1794_v38, %v1793_v36  ;;  %v1696_v31 = vadd.f32 %v1695_v1, %v1694_v41 }
 0x26f   : > { %v1622_v32 = vadd.f32 %v1571_v63, %v3583_v47 }
 0x270   : > { %1657 = vst.msk [vmem:[%s3679_s22 + $0x78] sm:$0xff] %vm975_vm0, %v1625_v37  ;;  %v1797_v50 = vadd.f32 %v1796_v44, %v1795_v5  ;;  %v1703_v34 = vsel %vm975_vm0, %v1625_v37, 0.0 }
 0x271   : > { %1654 = vst.msk [vmem:[%s3679_s22 + $0x60] sm:$0xff] %vm975_vm0, %v1622_v32  ;;  %v1697_v54 = vsel %vm975_vm0, %v1622_v32, 0.0  ;;  %v1755_v51 = vmul.f32 %v1622_v32, %v1622_v32  ;;  %v1581_v45 = vpop.permute.xlu0 %1580 }
 0x272   : > { %v1698_v46 = vadd.f32 %v1697_v54, %v1696_v31  ;;  %v1627_v55 = vadd.f32 %v1581_v45, %v3590_v35  ;;  %v1758_v35 = vmul.f32 %v1625_v37, %v1625_v37 }
 0x273   : > { %v1798_v58 = vsel %vm975_vm0, %v1755_v51, 0.0  ;;  %v1575_v47 = vpop.permute.xlu1 %1574 }
 0x274   : > { %v1799_v23 = vadd.f32 %v1798_v58, %v1797_v50  ;;  %v1700_v8 = vadd.f32 %v1699_v7, %v1698_v46  ;;  %v1624_v4 = vadd.f32 %v1575_v47, %v3593_v57  ;;  %1659 = vst.msk [vmem:[%s3679_s22 + $0x88] sm:$0xff] %vm975_vm0, %v1627_v55  ;;  %v1804_v3 = vsel %vm975_vm0, %v1758_v35, 0.0 }
 0x275   : > { %v1760_v40 = vmul.f32 %v1627_v55, %v1627_v55  ;;  %v1707_v16 = vsel %vm975_vm0, %v1627_v55, 0.0 }
 0x276   : > { %v1801_v6 = vadd.f32 %v1800_v26, %v1799_v23  ;;  %1656 = vst.msk [vmem:[%s3679_s22 + $0x70] sm:$0xff] %vm975_vm0, %v1624_v4  ;;  %v1701_v0 = vsel %vm975_vm0, %v1624_v4, 0.0  ;;  %v1757_v49 = vmul.f32 %v1624_v4, %v1624_v4 }
 0x277   : > { %v1702_v59 = vadd.f32 %v1701_v0, %v1700_v8  ;;  %v1808_v21 = vsel %vm975_vm0, %v1760_v40, 0.0 }
 0x278   : > { %v1802_v52 = vsel %vm975_vm0, %v1757_v49, 0.0 }
 0x279   : > { %v1803_v15 = vadd.f32 %v1802_v52, %v1801_v6  ;;  %v1704_v25 = vadd.f32 %v1703_v34, %v1702_v59 }
 0x27a   : > { %v1585_v57 = vpop.permute.xlu0 %1584 }
 0x27b   : > { %v1579_v33 = vpop.permute.xlu1 %1578  ;;  %v1629_v22 = vadd.f32 %v1585_v57, %v3600_v39  ;;  %v1805_v48 = vadd.f32 %v1804_v3, %v1803_v15 }
 0x27c   : > { %v1626_v30 = vadd.f32 %v1579_v33, %v3603_v2 }
 0x27d   : > { %1661 = vst.msk [vmem:[%s3679_s22 + $0x98] sm:$0xff] %vm975_vm0, %v1629_v22  ;;  %v1762_v5 = vmul.f32 %v1629_v22, %v1629_v22  ;;  %v1711_v44 = vsel %vm975_vm0, %v1629_v22, 0.0 }
 0x27e   : > { %1658 = vst.msk [vmem:[%s3679_s22 + $0x80] sm:$0xff] %vm975_vm0, %v1626_v30  ;;  %v1705_v11 = vsel %vm975_vm0, %v1626_v30, 0.0  ;;  %v1759_v19 = vmul.f32 %v1626_v30, %v1626_v30  ;;  %v1589_v61 = vpop.permute.xlu0 %1588 }
 0x27f   : > { %v1706_v62 = vadd.f32 %v1705_v11, %v1704_v25  ;;  %v1583_v42 = vpop.permute.xlu1 %1582  ;;  %v1631_v39 = vadd.f32 %v1589_v61, %v3610_v20  ;;  %v1812_v51 = vsel %vm975_vm0, %v1762_v5, 0.0 }
 0x280   : > { %v1806_v36 = vsel %vm975_vm0, %v1759_v19, 0.0  ;;  %v1628_v2 = vadd.f32 %v1583_v42, %v3613_v10 }
 0x281   : > { %v1807_v18 = vadd.f32 %v1806_v36, %v1805_v48  ;;  %1663 = vst.msk [vmem:[%s3679_s22 + $0xa8] sm:$0xff] %vm975_vm0, %v1631_v39  ;;  %v1708_v17 = vadd.f32 %v1707_v16, %v1706_v62  ;;  %v1764_v55 = vmul.f32 %v1631_v39, %v1631_v39  ;;  %v1715_v4 = vsel %vm975_vm0, %v1631_v39, 0.0 }
 0x282   : > { %1660 = vst.msk [vmem:[%s3679_s22 + $0x90] sm:$0xff] %vm975_vm0, %v1628_v2  ;;  %v1761_v41 = vmul.f32 %v1628_v2, %v1628_v2  ;;  %v1709_v38 = vsel %vm975_vm0, %v1628_v2, 0.0  ;;  %v1593_v20 = vpop.permute.xlu0 %1592 }
 0x283   : > { %v1809_v1 = vadd.f32 %v1808_v21, %v1807_v18  ;;  %v1633_v63 = vadd.f32 %v1593_v20, %v3620_v9  ;;  %v1710_v37 = vadd.f32 %v1709_v38, %v1708_v17  ;;  %v1816_v59 = vsel %vm975_vm0, %v1764_v55, 0.0 }
 0x284   : > { %v1810_v10 = vsel %vm975_vm0, %v1761_v41, 0.0 }
 0x285   : > { %1665 = vst.msk [vmem:[%s3679_s22 + $0xb8] sm:$0xff] %vm975_vm0, %v1633_v63  ;;  %v1811_v31 = vadd.f32 %v1810_v10, %v1809_v1  ;;  %v1712_v54 = vadd.f32 %v1711_v44, %v1710_v37  ;;  %v1719_v22 = vsel %vm975_vm0, %v1633_v63, 0.0 }
 0x287   : > { %v1587_v32 = vpop.permute.xlu1 %1586  ;;  %v1813_v46 = vadd.f32 %v1812_v51, %v1811_v31 }
 0x288   : > { %v1630_v50 = vadd.f32 %v1587_v32, %v3625_v24 }
 0x28a   : > { %1662 = vst.msk [vmem:[%s3679_s22 + $0xa0] sm:$0xff] %vm975_vm0, %v1630_v50  ;;  %v1713_v9 = vsel %vm975_vm0, %v1630_v50, 0.0  ;;  %v1763_v43 = vmul.f32 %v1630_v50, %v1630_v50 }
 0x28b   : > { %v1591_v45 = vpop.permute.xlu1 %1590  ;;  %v1714_v47 = vadd.f32 %v1713_v9, %v1712_v54 }
 0x28c   : > { %v1814_v58 = vsel %vm975_vm0, %v1763_v43, 0.0  ;;  %v1632_v7 = vadd.f32 %v1591_v45, %v3630_v60 }
 0x28d   : > { %v1815_v24 = vadd.f32 %v1814_v58, %v1813_v46  ;;  %v1716_v49 = vadd.f32 %v1715_v4, %v1714_v47 }
 0x28e   : > { %1664 = vst.msk [vmem:[%s3679_s22 + $0xb0] sm:$0xff] %vm975_vm0, %v1632_v7  ;;  %v1765_v26 = vmul.f32 %v1632_v7, %v1632_v7  ;;  %v1717_v60 = vsel %vm975_vm0, %v1632_v7, 0.0 }
 0x28f   : > { %v1595_v23 = vpop.permute.xlu1 %1594  ;;  %v1597_v8 = vpop.permute.xlu0 %1596  ;;  %v1817_v52 = vadd.f32 %v1816_v59, %v1815_v24  ;;  %v1718_v34 = vadd.f32 %v1717_v60, %v1716_v49 }
 0x290   : > { %v1634_v6 = vadd.f32 %v1595_v23, %v3635_v28  ;;  %v1635_v0 = vadd.f32 %v1597_v8, %v3638_v12  ;;  %v1818_v35 = vsel %vm975_vm0, %v1765_v26, 0.0  ;;  %v1766_v28 = vmul.f32 %v1633_v63, %v1633_v63 }
 0x291   : > { %v1819_v12 = vadd.f32 %v1818_v35, %v1817_v52  ;;  %v1720_v11 = vadd.f32 %v1719_v22, %v1718_v34 }
 0x292   : > { %1666 = vst.msk [vmem:[%s3679_s22 + $0xc0] sm:$0xff] %vm975_vm0, %v1634_v6  ;;  %1667 = vst.msk [vmem:[%s3679_s22 + $0xc8] sm:$0xff] %vm975_vm0, %v1635_v0  ;;  %v1767_v25 = vmul.f32 %v1634_v6, %v1634_v6  ;;  %v1721_v3 = vsel %vm975_vm0, %v1634_v6, 0.0  ;;  %v1768_v30 = vmul.f32 %v1635_v0, %v1635_v0  ;;  %v1820_v19 = vsel %vm975_vm0, %v1766_v28, 0.0 }
 0x293   : > { %v1821_v42 = vadd.f32 %v1820_v19, %v1819_v12  ;;  %v1722_v39 = vadd.f32 %v1721_v3, %v1720_v11 }
 0x294   : > { %v1822_v61 = vsel %vm975_vm0, %v1767_v25, 0.0  ;;  %v1824_v2 = vsel %vm975_vm0, %v1768_v30, 0.0 }
 0x295   : > { %v1599_v15 = vpop.permute.xlu1 %1598  ;;  %v1823_v16 = vadd.f32 %v1822_v61, %v1821_v42 }
 0x296   : > { %v1636_v57 = vadd.f32 %v1599_v15, %v3645_v27  ;;  %v1723_v27 = vsel %vm975_vm0, %v1635_v0, 0.0 }
 0x297   : > { %v1724_v17 = vadd.f32 %v1723_v27, %v1722_v39  ;;  %v1825_v63 = vadd.f32 %v1824_v2, %v1823_v16 }
 0x298   : > { %1668 = vst.msk [vmem:[%s3679_s22 + $0xd0] sm:$0xff] %vm975_vm0, %v1636_v57  ;;  %v1601_v33 = vpop.permute.xlu0 %1600  ;;  %v1769_v62 = vmul.f32 %v1636_v57, %v1636_v57 }
 0x299   : > { %v1637_v48 = vadd.f32 %v1601_v33, %v3650_v53  ;;  %v1725_v53 = vsel %vm975_vm0, %v1636_v57, 0.0 }
 0x29a   : > { %v1603_v40 = vpop.permute.xlu1 %1602  ;;  %v1826_v21 = vsel %vm975_vm0, %v1769_v62, 0.0  ;;  %v1726_v10 = vadd.f32 %v1725_v53, %v1724_v17 }
 0x29b   : > { %1669 = vst.msk [vmem:[%s3679_s22 + $0xd8] sm:$0xff] %vm975_vm0, %v1637_v48  ;;  %v1638_v36 = vadd.f32 %v1603_v40, %v3655_v14  ;;  %v1770_v18 = vmul.f32 %v1637_v48, %v1637_v48  ;;  %v1727_v38 = vsel %vm975_vm0, %v1637_v48, 0.0  ;;  %v1827_v44 = vadd.f32 %v1826_v21, %v1825_v63 }
 0x29c   : > { %v1728_v50 = vadd.f32 %v1727_v38, %v1726_v10 }
 0x29d   : > { %1670 = vst.msk [vmem:[%s3679_s22 + $0xe0] sm:$0xff] %vm975_vm0, %v1638_v36  ;;  %v1605_v41 = vpop.permute.xlu0 %1604  ;;  %v1771_v20 = vmul.f32 %v1638_v36, %v1638_v36  ;;  %v1828_v5 = vsel %vm975_vm0, %v1770_v18, 0.0  ;;  %v1729_v31 = vsel %vm975_vm0, %v1638_v36, 0.0 }
 0x29e   : > { %v1639_v1 = vadd.f32 %v1605_v41, %v3660_v56  ;;  %v1607_v14 = vpop.permute.xlu1 %1606  ;;  %v1829_v9 = vadd.f32 %v1828_v5, %v1827_v44 }
 0x29f   : > { %v1640_v37 = vadd.f32 %v1607_v14, %v3663_v13  ;;  %v1830_v54 = vsel %vm975_vm0, %v1771_v20, 0.0  ;;  %v1730_v13 = vadd.f32 %v1729_v31, %v1728_v50 }
 0x2a0   : > { %1671 = vst.msk [vmem:[%s3679_s22 + $0xe8] sm:$0xff] %vm975_vm0, %v1639_v1  ;;  %v1772_v32 = vmul.f32 %v1639_v1, %v1639_v1  ;;  %v1731_v56 = vsel %vm975_vm0, %v1639_v1, 0.0  ;;  %v1831_v45 = vadd.f32 %v1830_v54, %v1829_v9 }
 0x2a1   : > { %1672 = vst.msk [vmem:[%s3679_s22 + $0xf0] sm:$0xff] %vm975_vm0, %v1640_v37  ;;  %v1773_v51 = vmul.f32 %v1640_v37, %v1640_v37  ;;  %v1733_v46 = vsel %vm975_vm0, %v1640_v37, 0.0  ;;  %v1732_v58 = vadd.f32 %v1731_v56, %v1730_v13 }
 0x2a2   : > { %v1832_v43 = vsel %vm975_vm0, %v1772_v32, 0.0 }
 0x2a3   : > { %v1834_v47 = vsel %vm975_vm0, %v1773_v51, 0.0  ;;  %v1833_v24 = vadd.f32 %v1832_v43, %v1831_v45  ;;  %v1734_v23 = vadd.f32 %v1733_v46, %v1732_v58 }
 0x2a5   : > { %v1609_v7 = vpop.permute.xlu0 %1608  ;;  %v1835_v26 = vadd.f32 %v1834_v47, %v1833_v24 }
 0x2a6   : > { %v1641_v55 = vadd.f32 %v1609_v7, %v3670_v29 }
 0x2a8   : > { %1673 = vst.msk [vmem:[%s3679_s22 + $0xf8] sm:$0xff] %vm975_vm0, %v1641_v55  ;;  %v1735_v8 = vsel %vm975_vm0, %v1641_v55, 0.0  ;;  %v1774_v4 = vmul.f32 %v1641_v55, %v1641_v55 }
 0x2a9   : > { %v1736_v6 = vadd.f32 %v1735_v8, %v1734_v23 }
 0x2aa   : > { %v1836_v0 = vsel %vm975_vm0, %v1774_v4, 0.0 }
 0x2ab   : > { %v1737_v49 = vrot.slane %v1736_v6, 4  ;;  %v1837_v59 = vadd.f32 %v1836_v0, %v1835_v26 }
 0x2ad   : > { %v1738_v60 = vadd.f32 %v1737_v49, %v1736_v6  ;;  %v1838_v52 = vrot.slane %v1837_v59, 4 }
 0x2af   : > { %v1739_v35 = vrot.slane %v1738_v60, 2  ;;  %v1839_v15 = vadd.f32 %v1838_v52, %v1837_v59 }
 0x2b1   : > { %v1740_v29 = vadd.f32 %v1739_v35, %v1738_v60  ;;  %v1840_v34 = vrot.slane %v1839_v15, 2 }
 0x2b3   : > { %v1741_v57 = vrot.slane %v1740_v29, 1  ;;  %v1841_v28 = vadd.f32 %v1840_v34, %v1839_v15 }
 0x2b5   : > { %v1742_v25 = vadd.f32 %v1741_v57, %v1740_v29  ;;  %v1842_v12 = vrot.slane %v1841_v28, 1 }
 0x2b7   : > { %v1843_v33 = vadd.f32 %v1842_v12, %v1841_v28  ;;  %1844 = vst.msk [vmem:[%s387_s30] sm:$0xff] %vm975_vm0, %v1742_v25 }
 0x2b9   : > { %1845 = vst.msk [vmem:[%s394_s10] sm:$0xff] %vm975_vm0, %v1843_v33 }
 0x2ba PF: > { %s18_s26 = sadd.s32 1, %s2229_s26   ;;  %s3927_s24 = smov %s2225_s25 }
 0x2bb   : > { %p15_p6 = scmp.ge.s32.totalorder %s18_s26, 4   ;;  %s3928_s25 = smov %s3930_s27 }
 0x2bd   :  { %17 = sbr.rel (!%p15_p6) target bundleno = 2 (0x2), region = 106 }

</bundles_post_ra>
